<compile_context>
chip_gen: v7x
topology: tpu7x:2x2x1
jax: 0.10.0
libtpu: 0.0.40
codegen_flags: <defaults>
</compile_context>

<pallas_src>
import functools

import jax
import jax.numpy as jnp
from jax.experimental import pallas as pl
from jax.experimental.pallas import tpu as pltpu


# ----------------------------------------------------------------------------
# Fused forward kernel: MLP -> stacked LSTM -> fc, per time chunk.
# ----------------------------------------------------------------------------
def _sigmoid(v):
    # 0.5 * tanh(0.5 x) + 0.5 == sigmoid(x); tanh issues on the EUP slot,
    # avoiding a VALU divide in the per-step elementwise epilogue.
    return 0.5 * jnp.tanh(0.5 * v) + 0.5


def _rtgr_fused_kernel(x_ref, w1_ref, b1_ref, w2_ref, b2_ref, *refs,
                       n_layers, t_chunk):
    lstm_refs = refs[:3 * n_layers]
    (wfc_ref, bfc_ref, h0_ref, c0_ref,
     out_ref, hn_ref, cn_ref,
     h_s, c_s) = refs[3 * n_layers:]

    chunk = pl.program_id(0)

    @pl.when(chunk == 0)
    def _():
        h_s[...] = h0_ref[...].astype(jnp.float32)
        c_s[...] = c0_ref[...].astype(jnp.float32)

    f32 = jnp.float32

    # Resident weights: load once per chunk, reuse across the unrolled loop.
    w1 = w1_ref[...]
    b1 = b1_ref[...]          # (1, 32)
    w2 = w2_ref[...]
    b2 = b2_ref[...]          # (1, E)
    wfc = wfc_ref[...]        # (H, OUT_PAD) lane-padded
    bfc = bfc_ref[...]        # (1, OUT_PAD)
    lw = []
    for l in range(n_layers):
        lw.append((lstm_refs[3 * l][...],      # (in_l, 4H)
                   lstm_refs[3 * l + 1][...],  # (H, 4H)
                   lstm_refs[3 * l + 2][...])) # (1, 4H)

    # Register-carried LSTM state within the chunk (scratch across chunks).
    h_carry = [h_s[l] for l in range(n_layers)]   # each (B, H) f32
    c_carry = [c_s[l] for l in range(n_layers)]
    hd = h_carry[0].shape[-1]

    x_blk = x_ref[...]                            # (B, Tc, in)

    for s in range(t_chunk):
        x_t = x_blk[:, s, :]                      # (B, in), static slice

        # --- fused MLP (fc1 + ReLU, fc2 + ReLU) ---
        h1 = jnp.dot(x_t, w1, preferred_element_type=f32) + b1
        h1 = jnp.maximum(h1, 0.0)
        inp = jnp.dot(h1.astype(w2.dtype), w2, preferred_element_type=f32) + b2
        inp = jnp.maximum(inp, 0.0)               # (B, E) f32

        # --- stacked LSTM cells, 2 fused matmuls per layer ---
        for l in range(n_layers):
            wih, whh, bg = lw[l]
            gates = (jnp.dot(inp.astype(wih.dtype), wih,
                             preferred_element_type=f32)
                     + jnp.dot(h_carry[l].astype(whh.dtype), whh,
                               preferred_element_type=f32)
                     + bg)                        # (B, 4H) lane-dense
            i_g = _sigmoid(gates[:, 0 * hd:1 * hd])
            f_g = _sigmoid(gates[:, 1 * hd:2 * hd])
            g_g = jnp.tanh(gates[:, 2 * hd:3 * hd])
            o_g = _sigmoid(gates[:, 3 * hd:4 * hd])
            c_new = f_g * c_carry[l] + i_g * g_g
            h_new = o_g * jnp.tanh(c_new)
            h_carry[l] = h_new
            c_carry[l] = c_new
            inp = h_new

        # --- fused final fc, lane-padded output (unmasked stores) ---
        out_t = jnp.dot(inp.astype(wfc.dtype), wfc,
                        preferred_element_type=f32) + bfc
        out_ref[:, s, :] = out_t.astype(out_ref.dtype)

    # Persist carries for the next chunk.
    for l in range(n_layers):
        h_s[l] = h_carry[l]
        c_s[l] = c_carry[l]

    # Final hidden state written exactly once.
    @pl.when(chunk == pl.num_programs(0) - 1)
    def _():
        for l in range(n_layers):
            hn_ref[l] = h_carry[l].astype(hn_ref.dtype)
            cn_ref[l] = c_carry[l].astype(cn_ref.dtype)


def _pick_time_chunk(t, max_chunk=64):
    """Largest chunk <= max_chunk that divides T and is a multiple of 8 (or T)."""
    if t <= max_chunk:
        return t
    for c in range(max_chunk - max_chunk % 8, 0, -8):
        if t % c == 0:
            return c
    return t


# ----------------------------------------------------------------------------
# One-time parameter packing (hoisted out of the forward path).
# ----------------------------------------------------------------------------
def pack_params(params):
    out_size = params["wfc"].shape[1]
    h = params["wfc"].shape[0]
    out_pad = max(128, -(-out_size // 128) * 128)

    packed = {
        "w1": params["w1"],
        "b1": params["b1"].reshape(1, -1),
        "w2": params["w2"],
        "b2": params["b2"].reshape(1, -1),
        "lstm": [],
        "out_size": out_size,
    }
    for (w_ih, w_hh, b_ih, b_hh) in params["lstm"]:
        four_h = w_ih.shape[0]
        packed["lstm"].append((
            jnp.transpose(w_ih),                     # (in_l, 4H), gate order i,f,g,o
            jnp.transpose(w_hh),                     # (H, 4H)
            (b_ih + b_hh).reshape(1, four_h),        # fused bias
        ))
    wfc_p = jnp.zeros((h, out_pad), params["wfc"].dtype)
    wfc_p = wfc_p.at[:, :out_size].set(params["wfc"])
    bfc_p = jnp.zeros((1, out_pad), params["bfc"].dtype)
    bfc_p = bfc_p.at[0, :out_size].set(params["bfc"])
    packed["wfc_pad"] = wfc_p
    packed["bfc_pad"] = bfc_p
    return packed


# ----------------------------------------------------------------------------
# RTGR forward (deterministic mode) — one pallas_call.
# ----------------------------------------------------------------------------
def rtgr_forward(packed, x, hidden):
    """x: (B, T, input_size); hidden = (h0, c0), each (n_layers, B, H).
    Returns (out, (h_n, c_n)) with out of shape (B*T, output_size), matching
    `out.contiguous().view(-1, out.size(-1))` in the PyTorch module."""
    b, t, in_size = x.shape
    h0, c0 = hidden
    n_layers, _, hd = h0.shape
    out_size = packed["out_size"]
    out_pad = packed["wfc_pad"].shape[1]

    t_chunk = _pick_time_chunk(t)
    n_chunks = t // t_chunk

    lstm_flat, lstm_specs = [], []
    for (wih, whh, bg) in packed["lstm"]:
        lstm_flat += [wih, whh, bg]
        lstm_specs += [
            pl.BlockSpec(wih.shape, lambda c: (0, 0)),   # weights resident
            pl.BlockSpec(whh.shape, lambda c: (0, 0)),
            pl.BlockSpec(bg.shape, lambda c: (0, 0)),
        ]

    kernel = functools.partial(_rtgr_fused_kernel,
                               n_layers=n_layers, t_chunk=t_chunk)

    out_pad_arr, h_n, c_n = pl.pallas_call(
        kernel,
        out_shape=(
            jax.ShapeDtypeStruct((b, t, out_pad), x.dtype),
            jax.ShapeDtypeStruct((n_layers, b, hd), x.dtype),
            jax.ShapeDtypeStruct((n_layers, b, hd), x.dtype),
        ),
        grid_spec=pltpu.PrefetchScalarGridSpec(
            num_scalar_prefetch=0,
            grid=(n_chunks,),
            in_specs=[
                pl.BlockSpec((b, t_chunk, in_size), lambda c: (0, c, 0)),
                pl.BlockSpec(packed["w1"].shape, lambda c: (0, 0)),
                pl.BlockSpec(packed["b1"].shape, lambda c: (0, 0)),
                pl.BlockSpec(packed["w2"].shape, lambda c: (0, 0)),
                pl.BlockSpec(packed["b2"].shape, lambda c: (0, 0)),
                *lstm_specs,
                pl.BlockSpec(packed["wfc_pad"].shape, lambda c: (0, 0)),
                pl.BlockSpec(packed["bfc_pad"].shape, lambda c: (0, 0)),
                pl.BlockSpec((n_layers, b, hd), lambda c: (0, 0, 0)),
                pl.BlockSpec((n_layers, b, hd), lambda c: (0, 0, 0)),
            ],
            out_specs=(
                pl.BlockSpec((b, t_chunk, out_pad), lambda c: (0, c, 0)),
                pl.BlockSpec((n_layers, b, hd), lambda c: (0, 0, 0)),
                pl.BlockSpec((n_layers, b, hd), lambda c: (0, 0, 0)),
            ),
            scratch_shapes=[
                pltpu.VMEM((n_layers, b, hd), jnp.float32),   # h carry
                pltpu.VMEM((n_layers, b, hd), jnp.float32),   # c carry
            ],
        ),
        compiler_params=pltpu.CompilerParams(
            dimension_semantics=("arbitrary",)),   # true time recurrence
    )(x, packed["w1"], packed["b1"], packed["w2"], packed["b2"],
      *lstm_flat, packed["wfc_pad"], packed["bfc_pad"], h0, c0)

    out = out_pad_arr[:, :, :out_size].reshape(b * t, out_size)
    return out, (h_n, c_n)


# ----------------------------------------------------------------------------
# Pure-JAX reference for correctness checking
# ----------------------------------------------------------------------------
def rtgr_reference(params, x, hidden):
    hp = jax.lax.Precision.HIGHEST
    b, t, _ = x.shape
    h1 = jnp.maximum(
        jnp.einsum("bti,ij->btj", x, params["w1"], precision=hp) + params["b1"], 0.0)
    emb = jnp.maximum(
        jnp.einsum("bti,ij->btj", h1, params["w2"], precision=hp) + params["b2"], 0.0)
    h0_all, c0_all = hidden
    seq = emb
    h_n, c_n = [], []
    for layer in range(h0_all.shape[0]):
        w_ih, w_hh, b_ih, b_hh = params["lstm"][layer]
        h_t, c_t = h0_all[layer], c0_all[layer]
        outs = []
        for step in range(t):
            x_t = seq[:, step, :]
            gates = (jnp.dot(x_t, w_ih.T, precision=hp)
                     + jnp.dot(h_t, w_hh.T, precision=hp) + b_ih + b_hh)
            hd = h_t.shape[-1]
            i_g = jax.nn.sigmoid(gates[:, :hd])
            f_g = jax.nn.sigmoid(gates[:, hd:2 * hd])
            g_g = jnp.tanh(gates[:, 2 * hd:3 * hd])
            o_g = jax.nn.sigmoid(gates[:, 3 * hd:])
            c_t = f_g * c_t + i_g * g_g
            h_t = o_g * jnp.tanh(c_t)
            outs.append(h_t)
        seq = jnp.stack(outs, axis=1)
        h_n.append(h_t)
        c_n.append(c_t)
    out = jnp.einsum("bth,ho->bto", seq, params["wfc"], precision=hp) + params["bfc"]
    return out.reshape(-1, out.shape[-1]), (jnp.stack(h_n, 0), jnp.stack(c_n, 0))


if __name__ == "__main__":
    key = jax.random.PRNGKey(0)
    batch, seq_len = 2, 8
    input_size, hidden_dim, n_layers, output_size = 32, 32, 1, 2
    embed = 16

    keys = jax.random.split(key, 14)

    def rnd(k, shape, scale=0.1):
        return scale * jax.random.normal(k, shape, dtype=jnp.float32)

    params = {
        "w1": rnd(keys[0], (input_size, 32)),
        "b1": rnd(keys[1], (32,)),
        "w2": rnd(keys[2], (32, embed)),
        "b2": rnd(keys[3], (embed,)),
        "lstm": [(
            rnd(keys[4], (4 * hidden_dim, embed)),
            rnd(keys[5], (4 * hidden_dim, hidden_dim)),
            rnd(keys[6], (4 * hidden_dim,)),
            rnd(keys[7], (4 * hidden_dim,)),
        )],
        "wfc": rnd(keys[8], (hidden_dim, output_size)),
        "bfc": rnd(keys[9], (output_size,)),
    }

    x = jax.random.normal(keys[10], (batch, seq_len, input_size), dtype=jnp.float32)
    h0 = rnd(keys[11], (n_layers, batch, hidden_dim), scale=0.5)
    c0 = rnd(keys[12], (n_layers, batch, hidden_dim), scale=0.5)

    # One-time weight packing, hoisted out of the forward path.
    packed = pack_params(params)

    out, (h_n, c_n) = rtgr_forward(packed, x, (h0, c0))
    out = jax.block_until_ready(out)
    h_n = jax.block_until_ready(h_n)
    c_n = jax.block_until_ready(c_n)

    assert out.shape == (batch * seq_len, output_size)
    assert h_n.shape == (n_layers, batch, hidden_dim)
    assert c_n.shape == (n_layers, batch, hidden_dim)
    assert bool(jnp.all(jnp.isfinite(out)))

    ref_out, (ref_h, ref_c) = rtgr_reference(params, x, (h0, c0))
    assert jnp.allclose(out, ref_out, atol=1e-3, rtol=1e-3), \
        float(jnp.max(jnp.abs(out - ref_out)))
    assert jnp.allclose(h_n, ref_h, atol=1e-3, rtol=1e-3)
    assert jnp.allclose(c_n, ref_c, atol=1e-3, rtol=1e-3)

    print("KERNEL_OK")
</pallas_src>

<mosaic_0001>
module attributes {stable_mosaic.version = 11 : i64} {
  func.func @_rtgr_fused_kernel(%arg0: i32, %arg1: memref<2x8x32xf32, #tpu.memory_space<vmem>>, %arg2: memref<32x32xf32, #tpu.memory_space<vmem>>, %arg3: memref<1x32xf32, #tpu.memory_space<vmem>>, %arg4: memref<32x16xf32, #tpu.memory_space<vmem>>, %arg5: memref<1x16xf32, #tpu.memory_space<vmem>>, %arg6: memref<16x128xf32, #tpu.memory_space<vmem>>, %arg7: memref<32x128xf32, #tpu.memory_space<vmem>>, %arg8: memref<1x128xf32, #tpu.memory_space<vmem>>, %arg9: memref<32x128xf32, #tpu.memory_space<vmem>>, %arg10: memref<1x128xf32, #tpu.memory_space<vmem>>, %arg11: memref<1x2x32xf32, #tpu.memory_space<vmem>>, %arg12: memref<1x2x32xf32, #tpu.memory_space<vmem>>, %arg13: memref<2x8x128xf32, #tpu.memory_space<vmem>>, %arg14: memref<1x2x32xf32, #tpu.memory_space<vmem>>, %arg15: memref<1x2x32xf32, #tpu.memory_space<vmem>>, %arg16: memref<1x2x32xf32, #tpu.memory_space<vmem>>, %arg17: memref<1x2x32xf32, #tpu.memory_space<vmem>>) attributes {dimension_semantics = [#tpu.dimension_semantics<arbitrary>], iteration_bounds = array<i64: 1>, scalar_prefetch = 0 : i64, scratch_operands = 2 : i64, tpu.core_type = #tpu.core_type<tc>, window_params = [{transform_indices = @transform_0, window_bounds = array<i64: 2, 8, 32>}, {pipeline_mode = #tpu.pipeline_mode<synchronous>, transform_indices = @transform_1, window_bounds = array<i64: 32, 32>}, {pipeline_mode = #tpu.pipeline_mode<synchronous>, transform_indices = @transform_2, window_bounds = array<i64: 1, 32>}, {pipeline_mode = #tpu.pipeline_mode<synchronous>, transform_indices = @transform_3, window_bounds = array<i64: 32, 16>}, {pipeline_mode = #tpu.pipeline_mode<synchronous>, transform_indices = @transform_4, window_bounds = array<i64: 1, 16>}, {pipeline_mode = #tpu.pipeline_mode<synchronous>, transform_indices = @transform_5, window_bounds = array<i64: 16, 128>}, {pipeline_mode = #tpu.pipeline_mode<synchronous>, transform_indices = @transform_6, window_bounds = array<i64: 32, 128>}, {pipeline_mode = #tpu.pipeline_mode<synchronous>, transform_indices = @transform_7, window_bounds = array<i64: 1, 128>}, {pipeline_mode = #tpu.pipeline_mode<synchronous>, transform_indices = @transform_8, window_bounds = array<i64: 32, 128>}, {pipeline_mode = #tpu.pipeline_mode<synchronous>, transform_indices = @transform_9, window_bounds = array<i64: 1, 128>}, {pipeline_mode = #tpu.pipeline_mode<synchronous>, transform_indices = @transform_10, window_bounds = array<i64: 1, 2, 32>}, {pipeline_mode = #tpu.pipeline_mode<synchronous>, transform_indices = @transform_11, window_bounds = array<i64: 1, 2, 32>}, {transform_indices = @transform_12, window_bounds = array<i64: 2, 8, 128>}, {pipeline_mode = #tpu.pipeline_mode<synchronous>, transform_indices = @transform_13, window_bounds = array<i64: 1, 2, 32>}, {pipeline_mode = #tpu.pipeline_mode<synchronous>, transform_indices = @transform_14, window_bounds = array<i64: 1, 2, 32>}]} {
    %c0_i32 = arith.constant 0 : i32
    %0 = arith.cmpi eq, %arg0, %c0_i32 : i32
    %1 = arith.extui %0 : i1 to i32
    %c0_i32_0 = arith.constant 0 : i32
    %2 = arith.cmpi ne, %1, %c0_i32_0 : i32
    scf.if %2 {
      %c0_179 = arith.constant 0 : index
      %c0_180 = arith.constant 0 : index
      %c0_181 = arith.constant 0 : index
      %458 = vector.load %arg11[%c0_179, %c0_180, %c0_181] : memref<1x2x32xf32, #tpu.memory_space<vmem>>, vector<1x2x32xf32>
      %c0_182 = arith.constant 0 : index
      %c0_183 = arith.constant 0 : index
      %c0_184 = arith.constant 0 : index
      %459 = vector.load %arg16[%c0_182, %c0_183, %c0_184] : memref<1x2x32xf32, #tpu.memory_space<vmem>>, vector<1x2x32xf32>
      tpu.vector_store %arg16[%c0_182, %c0_183, %c0_184], %458 {strides = array<i32>} : memref<1x2x32xf32, #tpu.memory_space<vmem>>, vector<1x2x32xf32>,
      %c0_185 = arith.constant 0 : index
      %c0_186 = arith.constant 0 : index
      %c0_187 = arith.constant 0 : index
      %460 = vector.load %arg12[%c0_185, %c0_186, %c0_187] : memref<1x2x32xf32, #tpu.memory_space<vmem>>, vector<1x2x32xf32>
      %c0_188 = arith.constant 0 : index
      %c0_189 = arith.constant 0 : index
      %c0_190 = arith.constant 0 : index
      %461 = vector.load %arg17[%c0_188, %c0_189, %c0_190] : memref<1x2x32xf32, #tpu.memory_space<vmem>>, vector<1x2x32xf32>
      tpu.vector_store %arg17[%c0_188, %c0_189, %c0_190], %460 {strides = array<i32>} : memref<1x2x32xf32, #tpu.memory_space<vmem>>, vector<1x2x32xf32>,
    } else {
    }
    %c0 = arith.constant 0 : index
    %c0_1 = arith.constant 0 : index
    %3 = vector.load %arg2[%c0, %c0_1] : memref<32x32xf32, #tpu.memory_space<vmem>>, vector<32x32xf32>
    %c0_2 = arith.constant 0 : index
    %c0_3 = arith.constant 0 : index
    %4 = vector.load %arg3[%c0_2, %c0_3] : memref<1x32xf32, #tpu.memory_space<vmem>>, vector<1x32xf32>
    %c0_4 = arith.constant 0 : index
    %c0_5 = arith.constant 0 : index
    %5 = vector.load %arg4[%c0_4, %c0_5] : memref<32x16xf32, #tpu.memory_space<vmem>>, vector<32x16xf32>
    %c0_6 = arith.constant 0 : index
    %c0_7 = arith.constant 0 : index
    %6 = vector.load %arg5[%c0_6, %c0_7] : memref<1x16xf32, #tpu.memory_space<vmem>>, vector<1x16xf32>
    %c0_8 = arith.constant 0 : index
    %c0_9 = arith.constant 0 : index
    %7 = vector.load %arg9[%c0_8, %c0_9] : memref<32x128xf32, #tpu.memory_space<vmem>>, vector<32x128xf32>
    %c0_10 = arith.constant 0 : index
    %c0_11 = arith.constant 0 : index
    %8 = vector.load %arg10[%c0_10, %c0_11] : memref<1x128xf32, #tpu.memory_space<vmem>>, vector<1x128xf32>
    %c0_12 = arith.constant 0 : index
    %c0_13 = arith.constant 0 : index
    %9 = vector.load %arg6[%c0_12, %c0_13] : memref<16x128xf32, #tpu.memory_space<vmem>>, vector<16x128xf32>
    %c0_14 = arith.constant 0 : index
    %c0_15 = arith.constant 0 : index
    %10 = vector.load %arg7[%c0_14, %c0_15] : memref<32x128xf32, #tpu.memory_space<vmem>>, vector<32x128xf32>
    %c0_16 = arith.constant 0 : index
    %c0_17 = arith.constant 0 : index
    %11 = vector.load %arg8[%c0_16, %c0_17] : memref<1x128xf32, #tpu.memory_space<vmem>>, vector<1x128xf32>
    %c0_18 = arith.constant 0 : index
    %c0_19 = arith.constant 0 : index
    %c0_20 = arith.constant 0 : index
    %12 = vector.load %arg16[%c0_18, %c0_19, %c0_20] : memref<1x2x32xf32, #tpu.memory_space<vmem>>, vector<1x2x32xf32>
    %13 = vector.shape_cast %12 : vector<1x2x32xf32> to vector<2x32xf32>
    %c0_21 = arith.constant 0 : index
    %c0_22 = arith.constant 0 : index
    %c0_23 = arith.constant 0 : index
    %14 = vector.load %arg17[%c0_21, %c0_22, %c0_23] : memref<1x2x32xf32, #tpu.memory_space<vmem>>, vector<1x2x32xf32>
    %15 = vector.shape_cast %14 : vector<1x2x32xf32> to vector<2x32xf32>
    %c0_24 = arith.constant 0 : index
    %c0_25 = arith.constant 0 : index
    %c0_26 = arith.constant 0 : index
    %16 = vector.load %arg1[%c0_24, %c0_25, %c0_26] : memref<2x8x32xf32, #tpu.memory_space<vmem>>, vector<2x8x32xf32>
    %17 = vector.extract_strided_slice %16 {offsets = [0, 0, 0], sizes = [2, 1, 32], strides = [1, 1, 1]} : vector<2x8x32xf32> to vector<2x1x32xf32>
    %18 = vector.shape_cast %17 : vector<2x1x32xf32> to vector<2x32xf32>
    %cst = arith.constant dense<0.000000e+00> : vector<2x32xf32>
    %19 = tpu.matmul %18, %3, %cst {dimension_numbers = #tpu.dot_dimension_numbers<[1], [0], [0], [1], [0, 0, 1, 1], [], []>} : vector<2x32xf32>, vector<32x32xf32>, vector<2x32xf32> -> vector<2x32xf32>
    %20 = vector.broadcast %4 : vector<1x32xf32> to vector<2x32xf32>
    %21 = arith.addf %19, %20 : vector<2x32xf32>
    %cst_27 = arith.constant 0.000000e+00 : f32
    %22 = vector.broadcast %cst_27 : f32 to vector<2x32xf32>
    %23 = arith.maximumf %21, %22 : vector<2x32xf32>
    %cst_28 = arith.constant dense<0.000000e+00> : vector<2x16xf32>
    %24 = tpu.matmul %23, %5, %cst_28 {dimension_numbers = #tpu.dot_dimension_numbers<[1], [0], [0], [1], [0, 0, 1, 1], [], []>} : vector<2x32xf32>, vector<32x16xf32>, vector<2x16xf32> -> vector<2x16xf32>
    %25 = vector.broadcast %6 : vector<1x16xf32> to vector<2x16xf32>
    %26 = arith.addf %24, %25 : vector<2x16xf32>
    %cst_29 = arith.constant 0.000000e+00 : f32
    %27 = vector.broadcast %cst_29 : f32 to vector<2x16xf32>
    %28 = arith.maximumf %26, %27 : vector<2x16xf32>
    %cst_30 = arith.constant dense<0.000000e+00> : vector<2x128xf32>
    %29 = tpu.matmul %28, %9, %cst_30 {dimension_numbers = #tpu.dot_dimension_numbers<[1], [0], [0], [1], [0, 0, 1, 1], [], []>} : vector<2x16xf32>, vector<16x128xf32>, vector<2x128xf32> -> vector<2x128xf32>
    %cst_31 = arith.constant dense<0.000000e+00> : vector<2x128xf32>
    %30 = tpu.matmul %13, %10, %cst_31 {dimension_numbers = #tpu.dot_dimension_numbers<[1], [0], [0], [1], [0, 0, 1, 1], [], []>} : vector<2x32xf32>, vector<32x128xf32>, vector<2x128xf32> -> vector<2x128xf32>
    %31 = arith.addf %29, %30 : vector<2x128xf32>
    %32 = vector.broadcast %11 : vector<1x128xf32> to vector<2x128xf32>
    %33 = arith.addf %31, %32 : vector<2x128xf32>
    %34 = vector.extract_strided_slice %33 {offsets = [0, 0], sizes = [2, 32], strides = [1, 1]} : vector<2x128xf32> to vector<2x32xf32>
    %cst_32 = arith.constant 5.000000e-01 : f32
    %35 = vector.broadcast %cst_32 : f32 to vector<2x32xf32>
    %36 = arith.mulf %35, %34 : vector<2x32xf32>
    %37 = math.tanh %36 : vector<2x32xf32>
    %cst_33 = arith.constant 5.000000e-01 : f32
    %38 = vector.broadcast %cst_33 : f32 to vector<2x32xf32>
    %39 = arith.mulf %38, %37 : vector<2x32xf32>
    %cst_34 = arith.constant 5.000000e-01 : f32
    %40 = vector.broadcast %cst_34 : f32 to vector<2x32xf32>
    %41 = arith.addf %39, %40 : vector<2x32xf32>
    %42 = vector.extract_strided_slice %33 {offsets = [0, 32], sizes = [2, 32], strides = [1, 1]} : vector<2x128xf32> to vector<2x32xf32>
    %cst_35 = arith.constant 5.000000e-01 : f32
    %43 = vector.broadcast %cst_35 : f32 to vector<2x32xf32>
    %44 = arith.mulf %43, %42 : vector<2x32xf32>
    %45 = math.tanh %44 : vector<2x32xf32>
    %cst_36 = arith.constant 5.000000e-01 : f32
    %46 = vector.broadcast %cst_36 : f32 to vector<2x32xf32>
    %47 = arith.mulf %46, %45 : vector<2x32xf32>
    %cst_37 = arith.constant 5.000000e-01 : f32
    %48 = vector.broadcast %cst_37 : f32 to vector<2x32xf32>
    %49 = arith.addf %47, %48 : vector<2x32xf32>
    %50 = vector.extract_strided_slice %33 {offsets = [0, 64], sizes = [2, 32], strides = [1, 1]} : vector<2x128xf32> to vector<2x32xf32>
    %51 = math.tanh %50 : vector<2x32xf32>
    %52 = vector.extract_strided_slice %33 {offsets = [0, 96], sizes = [2, 32], strides = [1, 1]} : vector<2x128xf32> to vector<2x32xf32>
    %cst_38 = arith.constant 5.000000e-01 : f32
    %53 = vector.broadcast %cst_38 : f32 to vector<2x32xf32>
    %54 = arith.mulf %53, %52 : vector<2x32xf32>
    %55 = math.tanh %54 : vector<2x32xf32>
    %cst_39 = arith.constant 5.000000e-01 : f32
    %56 = vector.broadcast %cst_39 : f32 to vector<2x32xf32>
    %57 = arith.mulf %56, %55 : vector<2x32xf32>
    %cst_40 = arith.constant 5.000000e-01 : f32
    %58 = vector.broadcast %cst_40 : f32 to vector<2x32xf32>
    %59 = arith.addf %57, %58 : vector<2x32xf32>
    %60 = arith.mulf %49, %15 : vector<2x32xf32>
    %61 = arith.mulf %41, %51 : vector<2x32xf32>
    %62 = arith.addf %60, %61 : vector<2x32xf32>
    %63 = math.tanh %62 : vector<2x32xf32>
    %64 = arith.mulf %59, %63 : vector<2x32xf32>
    %cst_41 = arith.constant dense<0.000000e+00> : vector<2x128xf32>
    %65 = tpu.matmul %64, %7, %cst_41 {dimension_numbers = #tpu.dot_dimension_numbers<[1], [0], [0], [1], [0, 0, 1, 1], [], []>} : vector<2x32xf32>, vector<32x128xf32>, vector<2x128xf32> -> vector<2x128xf32>
    %66 = vector.broadcast %8 : vector<1x128xf32> to vector<2x128xf32>
    %67 = arith.addf %65, %66 : vector<2x128xf32>
    %c0_42 = arith.constant 0 : index
    %c0_43 = arith.constant 0 : index
    %c0_44 = arith.constant 0 : index
    %68 = vector.load %arg13[%c0_42, %c0_43, %c0_44] : memref<2x8x128xf32, #tpu.memory_space<vmem>>, vector<2x1x128xf32>
    %69 = vector.shape_cast %68 : vector<2x1x128xf32> to vector<2x128xf32>
    %70 = vector.shape_cast %67 : vector<2x128xf32> to vector<2x1x128xf32>
    tpu.vector_store %arg13[%c0_42, %c0_43, %c0_44], %70 {strides = array<i32>} : memref<2x8x128xf32, #tpu.memory_space<vmem>>, vector<2x1x128xf32>,
    %71 = vector.extract_strided_slice %16 {offsets = [0, 1, 0], sizes = [2, 1, 32], strides = [1, 1, 1]} : vector<2x8x32xf32> to vector<2x1x32xf32>
    %72 = vector.shape_cast %71 : vector<2x1x32xf32> to vector<2x32xf32>
    %cst_45 = arith.constant dense<0.000000e+00> : vector<2x32xf32>
    %73 = tpu.matmul %72, %3, %cst_45 {dimension_numbers = #tpu.dot_dimension_numbers<[1], [0], [0], [1], [0, 0, 1, 1], [], []>} : vector<2x32xf32>, vector<32x32xf32>, vector<2x32xf32> -> vector<2x32xf32>
    %74 = vector.broadcast %4 : vector<1x32xf32> to vector<2x32xf32>
    %75 = arith.addf %73, %74 : vector<2x32xf32>
    %cst_46 = arith.constant 0.000000e+00 : f32
    %76 = vector.broadcast %cst_46 : f32 to vector<2x32xf32>
    %77 = arith.maximumf %75, %76 : vector<2x32xf32>
    %cst_47 = arith.constant dense<0.000000e+00> : vector<2x16xf32>
    %78 = tpu.matmul %77, %5, %cst_47 {dimension_numbers = #tpu.dot_dimension_numbers<[1], [0], [0], [1], [0, 0, 1, 1], [], []>} : vector<2x32xf32>, vector<32x16xf32>, vector<2x16xf32> -> vector<2x16xf32>
    %79 = vector.broadcast %6 : vector<1x16xf32> to vector<2x16xf32>
    %80 = arith.addf %78, %79 : vector<2x16xf32>
    %cst_48 = arith.constant 0.000000e+00 : f32
    %81 = vector.broadcast %cst_48 : f32 to vector<2x16xf32>
    %82 = arith.maximumf %80, %81 : vector<2x16xf32>
    %cst_49 = arith.constant dense<0.000000e+00> : vector<2x128xf32>
    %83 = tpu.matmul %82, %9, %cst_49 {dimension_numbers = #tpu.dot_dimension_numbers<[1], [0], [0], [1], [0, 0, 1, 1], [], []>} : vector<2x16xf32>, vector<16x128xf32>, vector<2x128xf32> -> vector<2x128xf32>
    %cst_50 = arith.constant dense<0.000000e+00> : vector<2x128xf32>
    %84 = tpu.matmul %64, %10, %cst_50 {dimension_numbers = #tpu.dot_dimension_numbers<[1], [0], [0], [1], [0, 0, 1, 1], [], []>} : vector<2x32xf32>, vector<32x128xf32>, vector<2x128xf32> -> vector<2x128xf32>
    %85 = arith.addf %83, %84 : vector<2x128xf32>
    %86 = vector.broadcast %11 : vector<1x128xf32> to vector<2x128xf32>
    %87 = arith.addf %85, %86 : vector<2x128xf32>
    %88 = vector.extract_strided_slice %87 {offsets = [0, 0], sizes = [2, 32], strides = [1, 1]} : vector<2x128xf32> to vector<2x32xf32>
    %cst_51 = arith.constant 5.000000e-01 : f32
    %89 = vector.broadcast %cst_51 : f32 to vector<2x32xf32>
    %90 = arith.mulf %89, %88 : vector<2x32xf32>
    %91 = math.tanh %90 : vector<2x32xf32>
    %cst_52 = arith.constant 5.000000e-01 : f32
    %92 = vector.broadcast %cst_52 : f32 to vector<2x32xf32>
    %93 = arith.mulf %92, %91 : vector<2x32xf32>
    %cst_53 = arith.constant 5.000000e-01 : f32
    %94 = vector.broadcast %cst_53 : f32 to vector<2x32xf32>
    %95 = arith.addf %93, %94 : vector<2x32xf32>
    %96 = vector.extract_strided_slice %87 {offsets = [0, 32], sizes = [2, 32], strides = [1, 1]} : vector<2x128xf32> to vector<2x32xf32>
    %cst_54 = arith.constant 5.000000e-01 : f32
    %97 = vector.broadcast %cst_54 : f32 to vector<2x32xf32>
    %98 = arith.mulf %97, %96 : vector<2x32xf32>
    %99 = math.tanh %98 : vector<2x32xf32>
    %cst_55 = arith.constant 5.000000e-01 : f32
    %100 = vector.broadcast %cst_55 : f32 to vector<2x32xf32>
    %101 = arith.mulf %100, %99 : vector<2x32xf32>
    %cst_56 = arith.constant 5.000000e-01 : f32
    %102 = vector.broadcast %cst_56 : f32 to vector<2x32xf32>
    %103 = arith.addf %101, %102 : vector<2x32xf32>
    %104 = vector.extract_strided_slice %87 {offsets = [0, 64], sizes = [2, 32], strides = [1, 1]} : vector<2x128xf32> to vector<2x32xf32>
    %105 = math.tanh %104 : vector<2x32xf32>
    %106 = vector.extract_strided_slice %87 {offsets = [0, 96], sizes = [2, 32], strides = [1, 1]} : vector<2x128xf32> to vector<2x32xf32>
    %cst_57 = arith.constant 5.000000e-01 : f32
    %107 = vector.broadcast %cst_57 : f32 to vector<2x32xf32>
    %108 = arith.mulf %107, %106 : vector<2x32xf32>
    %109 = math.tanh %108 : vector<2x32xf32>
    %cst_58 = arith.constant 5.000000e-01 : f32
    %110 = vector.broadcast %cst_58 : f32 to vector<2x32xf32>
    %111 = arith.mulf %110, %109 : vector<2x32xf32>
    %cst_59 = arith.constant 5.000000e-01 : f32
    %112 = vector.broadcast %cst_59 : f32 to vector<2x32xf32>
    %113 = arith.addf %111, %112 : vector<2x32xf32>
    %114 = arith.mulf %103, %62 : vector<2x32xf32>
    %115 = arith.mulf %95, %105 : vector<2x32xf32>
    %116 = arith.addf %114, %115 : vector<2x32xf32>
    %117 = math.tanh %116 : vector<2x32xf32>
    %118 = arith.mulf %113, %117 : vector<2x32xf32>
    %cst_60 = arith.constant dense<0.000000e+00> : vector<2x128xf32>
    %119 = tpu.matmul %118, %7, %cst_60 {dimension_numbers = #tpu.dot_dimension_numbers<[1], [0], [0], [1], [0, 0, 1, 1], [], []>} : vector<2x32xf32>, vector<32x128xf32>, vector<2x128xf32> -> vector<2x128xf32>
    %120 = vector.broadcast %8 : vector<1x128xf32> to vector<2x128xf32>
    %121 = arith.addf %119, %120 : vector<2x128xf32>
    %c0_61 = arith.constant 0 : index
    %c1 = arith.constant 1 : index
    %c0_62 = arith.constant 0 : index
    %122 = vector.load %arg13[%c0_61, %c1, %c0_62] : memref<2x8x128xf32, #tpu.memory_space<vmem>>, vector<2x1x128xf32>
    %123 = vector.shape_cast %122 : vector<2x1x128xf32> to vector<2x128xf32>
    %124 = vector.shape_cast %121 : vector<2x128xf32> to vector<2x1x128xf32>
    tpu.vector_store %arg13[%c0_61, %c1, %c0_62], %124 {strides = array<i32>} : memref<2x8x128xf32, #tpu.memory_space<vmem>>, vector<2x1x128xf32>,
    %125 = vector.extract_strided_slice %16 {offsets = [0, 2, 0], sizes = [2, 1, 32], strides = [1, 1, 1]} : vector<2x8x32xf32> to vector<2x1x32xf32>
    %126 = vector.shape_cast %125 : vector<2x1x32xf32> to vector<2x32xf32>
    %cst_63 = arith.constant dense<0.000000e+00> : vector<2x32xf32>
    %127 = tpu.matmul %126, %3, %cst_63 {dimension_numbers = #tpu.dot_dimension_numbers<[1], [0], [0], [1], [0, 0, 1, 1], [], []>} : vector<2x32xf32>, vector<32x32xf32>, vector<2x32xf32> -> vector<2x32xf32>
    %128 = vector.broadcast %4 : vector<1x32xf32> to vector<2x32xf32>
    %129 = arith.addf %127, %128 : vector<2x32xf32>
    %cst_64 = arith.constant 0.000000e+00 : f32
    %130 = vector.broadcast %cst_64 : f32 to vector<2x32xf32>
    %131 = arith.maximumf %129, %130 : vector<2x32xf32>
    %cst_65 = arith.constant dense<0.000000e+00> : vector<2x16xf32>
    %132 = tpu.matmul %131, %5, %cst_65 {dimension_numbers = #tpu.dot_dimension_numbers<[1], [0], [0], [1], [0, 0, 1, 1], [], []>} : vector<2x32xf32>, vector<32x16xf32>, vector<2x16xf32> -> vector<2x16xf32>
    %133 = vector.broadcast %6 : vector<1x16xf32> to vector<2x16xf32>
    %134 = arith.addf %132, %133 : vector<2x16xf32>
    %cst_66 = arith.constant 0.000000e+00 : f32
    %135 = vector.broadcast %cst_66 : f32 to vector<2x16xf32>
    %136 = arith.maximumf %134, %135 : vector<2x16xf32>
    %cst_67 = arith.constant dense<0.000000e+00> : vector<2x128xf32>
    %137 = tpu.matmul %136, %9, %cst_67 {dimension_numbers = #tpu.dot_dimension_numbers<[1], [0], [0], [1], [0, 0, 1, 1], [], []>} : vector<2x16xf32>, vector<16x128xf32>, vector<2x128xf32> -> vector<2x128xf32>
    %cst_68 = arith.constant dense<0.000000e+00> : vector<2x128xf32>
    %138 = tpu.matmul %118, %10, %cst_68 {dimension_numbers = #tpu.dot_dimension_numbers<[1], [0], [0], [1], [0, 0, 1, 1], [], []>} : vector<2x32xf32>, vector<32x128xf32>, vector<2x128xf32> -> vector<2x128xf32>
    %139 = arith.addf %137, %138 : vector<2x128xf32>
    %140 = vector.broadcast %11 : vector<1x128xf32> to vector<2x128xf32>
    %141 = arith.addf %139, %140 : vector<2x128xf32>
    %142 = vector.extract_strided_slice %141 {offsets = [0, 0], sizes = [2, 32], strides = [1, 1]} : vector<2x128xf32> to vector<2x32xf32>
    %cst_69 = arith.constant 5.000000e-01 : f32
    %143 = vector.broadcast %cst_69 : f32 to vector<2x32xf32>
    %144 = arith.mulf %143, %142 : vector<2x32xf32>
    %145 = math.tanh %144 : vector<2x32xf32>
    %cst_70 = arith.constant 5.000000e-01 : f32
    %146 = vector.broadcast %cst_70 : f32 to vector<2x32xf32>
    %147 = arith.mulf %146, %145 : vector<2x32xf32>
    %cst_71 = arith.constant 5.000000e-01 : f32
    %148 = vector.broadcast %cst_71 : f32 to vector<2x32xf32>
    %149 = arith.addf %147, %148 : vector<2x32xf32>
    %150 = vector.extract_strided_slice %141 {offsets = [0, 32], sizes = [2, 32], strides = [1, 1]} : vector<2x128xf32> to vector<2x32xf32>
    %cst_72 = arith.constant 5.000000e-01 : f32
    %151 = vector.broadcast %cst_72 : f32 to vector<2x32xf32>
    %152 = arith.mulf %151, %150 : vector<2x32xf32>
    %153 = math.tanh %152 : vector<2x32xf32>
    %cst_73 = arith.constant 5.000000e-01 : f32
    %154 = vector.broadcast %cst_73 : f32 to vector<2x32xf32>
    %155 = arith.mulf %154, %153 : vector<2x32xf32>
    %cst_74 = arith.constant 5.000000e-01 : f32
    %156 = vector.broadcast %cst_74 : f32 to vector<2x32xf32>
    %157 = arith.addf %155, %156 : vector<2x32xf32>
    %158 = vector.extract_strided_slice %141 {offsets = [0, 64], sizes = [2, 32], strides = [1, 1]} : vector<2x128xf32> to vector<2x32xf32>
    %159 = math.tanh %158 : vector<2x32xf32>
    %160 = vector.extract_strided_slice %141 {offsets = [0, 96], sizes = [2, 32], strides = [1, 1]} : vector<2x128xf32> to vector<2x32xf32>
    %cst_75 = arith.constant 5.000000e-01 : f32
    %161 = vector.broadcast %cst_75 : f32 to vector<2x32xf32>
    %162 = arith.mulf %161, %160 : vector<2x32xf32>
    %163 = math.tanh %162 : vector<2x32xf32>
    %cst_76 = arith.constant 5.000000e-01 : f32
    %164 = vector.broadcast %cst_76 : f32 to vector<2x32xf32>
    %165 = arith.mulf %164, %163 : vector<2x32xf32>
    %cst_77 = arith.constant 5.000000e-01 : f32
    %166 = vector.broadcast %cst_77 : f32 to vector<2x32xf32>
    %167 = arith.addf %165, %166 : vector<2x32xf32>
    %168 = arith.mulf %157, %116 : vector<2x32xf32>
    %169 = arith.mulf %149, %159 : vector<2x32xf32>
    %170 = arith.addf %168, %169 : vector<2x32xf32>
    %171 = math.tanh %170 : vector<2x32xf32>
    %172 = arith.mulf %167, %171 : vector<2x32xf32>
    %cst_78 = arith.constant dense<0.000000e+00> : vector<2x128xf32>
    %173 = tpu.matmul %172, %7, %cst_78 {dimension_numbers = #tpu.dot_dimension_numbers<[1], [0], [0], [1], [0, 0, 1, 1], [], []>} : vector<2x32xf32>, vector<32x128xf32>, vector<2x128xf32> -> vector<2x128xf32>
    %174 = vector.broadcast %8 : vector<1x128xf32> to vector<2x128xf32>
    %175 = arith.addf %173, %174 : vector<2x128xf32>
    %c0_79 = arith.constant 0 : index
    %c2 = arith.constant 2 : index
    %c0_80 = arith.constant 0 : index
    %176 = vector.load %arg13[%c0_79, %c2, %c0_80] : memref<2x8x128xf32, #tpu.memory_space<vmem>>, vector<2x1x128xf32>
    %177 = vector.shape_cast %176 : vector<2x1x128xf32> to vector<2x128xf32>
    %178 = vector.shape_cast %175 : vector<2x128xf32> to vector<2x1x128xf32>
    tpu.vector_store %arg13[%c0_79, %c2, %c0_80], %178 {strides = array<i32>} : memref<2x8x128xf32, #tpu.memory_space<vmem>>, vector<2x1x128xf32>,
    %179 = vector.extract_strided_slice %16 {offsets = [0, 3, 0], sizes = [2, 1, 32], strides = [1, 1, 1]} : vector<2x8x32xf32> to vector<2x1x32xf32>
    %180 = vector.shape_cast %179 : vector<2x1x32xf32> to vector<2x32xf32>
    %cst_81 = arith.constant dense<0.000000e+00> : vector<2x32xf32>
    %181 = tpu.matmul %180, %3, %cst_81 {dimension_numbers = #tpu.dot_dimension_numbers<[1], [0], [0], [1], [0, 0, 1, 1], [], []>} : vector<2x32xf32>, vector<32x32xf32>, vector<2x32xf32> -> vector<2x32xf32>
    %182 = vector.broadcast %4 : vector<1x32xf32> to vector<2x32xf32>
    %183 = arith.addf %181, %182 : vector<2x32xf32>
    %cst_82 = arith.constant 0.000000e+00 : f32
    %184 = vector.broadcast %cst_82 : f32 to vector<2x32xf32>
    %185 = arith.maximumf %183, %184 : vector<2x32xf32>
    %cst_83 = arith.constant dense<0.000000e+00> : vector<2x16xf32>
    %186 = tpu.matmul %185, %5, %cst_83 {dimension_numbers = #tpu.dot_dimension_numbers<[1], [0], [0], [1], [0, 0, 1, 1], [], []>} : vector<2x32xf32>, vector<32x16xf32>, vector<2x16xf32> -> vector<2x16xf32>
    %187 = vector.broadcast %6 : vector<1x16xf32> to vector<2x16xf32>
    %188 = arith.addf %186, %187 : vector<2x16xf32>
    %cst_84 = arith.constant 0.000000e+00 : f32
    %189 = vector.broadcast %cst_84 : f32 to vector<2x16xf32>
    %190 = arith.maximumf %188, %189 : vector<2x16xf32>
    %cst_85 = arith.constant dense<0.000000e+00> : vector<2x128xf32>
    %191 = tpu.matmul %190, %9, %cst_85 {dimension_numbers = #tpu.dot_dimension_numbers<[1], [0], [0], [1], [0, 0, 1, 1], [], []>} : vector<2x16xf32>, vector<16x128xf32>, vector<2x128xf32> -> vector<2x128xf32>
    %cst_86 = arith.constant dense<0.000000e+00> : vector<2x128xf32>
    %192 = tpu.matmul %172, %10, %cst_86 {dimension_numbers = #tpu.dot_dimension_numbers<[1], [0], [0], [1], [0, 0, 1, 1], [], []>} : vector<2x32xf32>, vector<32x128xf32>, vector<2x128xf32> -> vector<2x128xf32>
    %193 = arith.addf %191, %192 : vector<2x128xf32>
    %194 = vector.broadcast %11 : vector<1x128xf32> to vector<2x128xf32>
    %195 = arith.addf %193, %194 : vector<2x128xf32>
    %196 = vector.extract_strided_slice %195 {offsets = [0, 0], sizes = [2, 32], strides = [1, 1]} : vector<2x128xf32> to vector<2x32xf32>
    %cst_87 = arith.constant 5.000000e-01 : f32
    %197 = vector.broadcast %cst_87 : f32 to vector<2x32xf32>
    %198 = arith.mulf %197, %196 : vector<2x32xf32>
    %199 = math.tanh %198 : vector<2x32xf32>
    %cst_88 = arith.constant 5.000000e-01 : f32
    %200 = vector.broadcast %cst_88 : f32 to vector<2x32xf32>
    %201 = arith.mulf %200, %199 : vector<2x32xf32>
    %cst_89 = arith.constant 5.000000e-01 : f32
    %202 = vector.broadcast %cst_89 : f32 to vector<2x32xf32>
    %203 = arith.addf %201, %202 : vector<2x32xf32>
    %204 = vector.extract_strided_slice %195 {offsets = [0, 32], sizes = [2, 32], strides = [1, 1]} : vector<2x128xf32> to vector<2x32xf32>
    %cst_90 = arith.constant 5.000000e-01 : f32
    %205 = vector.broadcast %cst_90 : f32 to vector<2x32xf32>
    %206 = arith.mulf %205, %204 : vector<2x32xf32>
    %207 = math.tanh %206 : vector<2x32xf32>
    %cst_91 = arith.constant 5.000000e-01 : f32
    %208 = vector.broadcast %cst_91 : f32 to vector<2x32xf32>
    %209 = arith.mulf %208, %207 : vector<2x32xf32>
    %cst_92 = arith.constant 5.000000e-01 : f32
    %210 = vector.broadcast %cst_92 : f32 to vector<2x32xf32>
    %211 = arith.addf %209, %210 : vector<2x32xf32>
    %212 = vector.extract_strided_slice %195 {offsets = [0, 64], sizes = [2, 32], strides = [1, 1]} : vector<2x128xf32> to vector<2x32xf32>
    %213 = math.tanh %212 : vector<2x32xf32>
    %214 = vector.extract_strided_slice %195 {offsets = [0, 96], sizes = [2, 32], strides = [1, 1]} : vector<2x128xf32> to vector<2x32xf32>
    %cst_93 = arith.constant 5.000000e-01 : f32
    %215 = vector.broadcast %cst_93 : f32 to vector<2x32xf32>
    %216 = arith.mulf %215, %214 : vector<2x32xf32>
    %217 = math.tanh %216 : vector<2x32xf32>
    %cst_94 = arith.constant 5.000000e-01 : f32
    %218 = vector.broadcast %cst_94 : f32 to vector<2x32xf32>
    %219 = arith.mulf %218, %217 : vector<2x32xf32>
    %cst_95 = arith.constant 5.000000e-01 : f32
    %220 = vector.broadcast %cst_95 : f32 to vector<2x32xf32>
    %221 = arith.addf %219, %220 : vector<2x32xf32>
    %222 = arith.mulf %211, %170 : vector<2x32xf32>
    %223 = arith.mulf %203, %213 : vector<2x32xf32>
    %224 = arith.addf %222, %223 : vector<2x32xf32>
    %225 = math.tanh %224 : vector<2x32xf32>
    %226 = arith.mulf %221, %225 : vector<2x32xf32>
    %cst_96 = arith.constant dense<0.000000e+00> : vector<2x128xf32>
    %227 = tpu.matmul %226, %7, %cst_96 {dimension_numbers = #tpu.dot_dimension_numbers<[1], [0], [0], [1], [0, 0, 1, 1], [], []>} : vector<2x32xf32>, vector<32x128xf32>, vector<2x128xf32> -> vector<2x128xf32>
    %228 = vector.broadcast %8 : vector<1x128xf32> to vector<2x128xf32>
    %229 = arith.addf %227, %228 : vector<2x128xf32>
    %c0_97 = arith.constant 0 : index
    %c3 = arith.constant 3 : index
    %c0_98 = arith.constant 0 : index
    %230 = vector.load %arg13[%c0_97, %c3, %c0_98] : memref<2x8x128xf32, #tpu.memory_space<vmem>>, vector<2x1x128xf32>
    %231 = vector.shape_cast %230 : vector<2x1x128xf32> to vector<2x128xf32>
    %232 = vector.shape_cast %229 : vector<2x128xf32> to vector<2x1x128xf32>
    tpu.vector_store %arg13[%c0_97, %c3, %c0_98], %232 {strides = array<i32>} : memref<2x8x128xf32, #tpu.memory_space<vmem>>, vector<2x1x128xf32>,
    %233 = vector.extract_strided_slice %16 {offsets = [0, 4, 0], sizes = [2, 1, 32], strides = [1, 1, 1]} : vector<2x8x32xf32> to vector<2x1x32xf32>
    %234 = vector.shape_cast %233 : vector<2x1x32xf32> to vector<2x32xf32>
    %cst_99 = arith.constant dense<0.000000e+00> : vector<2x32xf32>
    %235 = tpu.matmul %234, %3, %cst_99 {dimension_numbers = #tpu.dot_dimension_numbers<[1], [0], [0], [1], [0, 0, 1, 1], [], []>} : vector<2x32xf32>, vector<32x32xf32>, vector<2x32xf32> -> vector<2x32xf32>
    %236 = vector.broadcast %4 : vector<1x32xf32> to vector<2x32xf32>
    %237 = arith.addf %235, %236 : vector<2x32xf32>
    %cst_100 = arith.constant 0.000000e+00 : f32
    %238 = vector.broadcast %cst_100 : f32 to vector<2x32xf32>
    %239 = arith.maximumf %237, %238 : vector<2x32xf32>
    %cst_101 = arith.constant dense<0.000000e+00> : vector<2x16xf32>
    %240 = tpu.matmul %239, %5, %cst_101 {dimension_numbers = #tpu.dot_dimension_numbers<[1], [0], [0], [1], [0, 0, 1, 1], [], []>} : vector<2x32xf32>, vector<32x16xf32>, vector<2x16xf32> -> vector<2x16xf32>
    %241 = vector.broadcast %6 : vector<1x16xf32> to vector<2x16xf32>
    %242 = arith.addf %240, %241 : vector<2x16xf32>
    %cst_102 = arith.constant 0.000000e+00 : f32
    %243 = vector.broadcast %cst_102 : f32 to vector<2x16xf32>
    %244 = arith.maximumf %242, %243 : vector<2x16xf32>
    %cst_103 = arith.constant dense<0.000000e+00> : vector<2x128xf32>
    %245 = tpu.matmul %244, %9, %cst_103 {dimension_numbers = #tpu.dot_dimension_numbers<[1], [0], [0], [1], [0, 0, 1, 1], [], []>} : vector<2x16xf32>, vector<16x128xf32>, vector<2x128xf32> -> vector<2x128xf32>
    %cst_104 = arith.constant dense<0.000000e+00> : vector<2x128xf32>
    %246 = tpu.matmul %226, %10, %cst_104 {dimension_numbers = #tpu.dot_dimension_numbers<[1], [0], [0], [1], [0, 0, 1, 1], [], []>} : vector<2x32xf32>, vector<32x128xf32>, vector<2x128xf32> -> vector<2x128xf32>
    %247 = arith.addf %245, %246 : vector<2x128xf32>
    %248 = vector.broadcast %11 : vector<1x128xf32> to vector<2x128xf32>
    %249 = arith.addf %247, %248 : vector<2x128xf32>
    %250 = vector.extract_strided_slice %249 {offsets = [0, 0], sizes = [2, 32], strides = [1, 1]} : vector<2x128xf32> to vector<2x32xf32>
    %cst_105 = arith.constant 5.000000e-01 : f32
    %251 = vector.broadcast %cst_105 : f32 to vector<2x32xf32>
    %252 = arith.mulf %251, %250 : vector<2x32xf32>
    %253 = math.tanh %252 : vector<2x32xf32>
    %cst_106 = arith.constant 5.000000e-01 : f32
    %254 = vector.broadcast %cst_106 : f32 to vector<2x32xf32>
    %255 = arith.mulf %254, %253 : vector<2x32xf32>
    %cst_107 = arith.constant 5.000000e-01 : f32
    %256 = vector.broadcast %cst_107 : f32 to vector<2x32xf32>
    %257 = arith.addf %255, %256 : vector<2x32xf32>
    %258 = vector.extract_strided_slice %249 {offsets = [0, 32], sizes = [2, 32], strides = [1, 1]} : vector<2x128xf32> to vector<2x32xf32>
    %cst_108 = arith.constant 5.000000e-01 : f32
    %259 = vector.broadcast %cst_108 : f32 to vector<2x32xf32>
    %260 = arith.mulf %259, %258 : vector<2x32xf32>
    %261 = math.tanh %260 : vector<2x32xf32>
    %cst_109 = arith.constant 5.000000e-01 : f32
    %262 = vector.broadcast %cst_109 : f32 to vector<2x32xf32>
    %263 = arith.mulf %262, %261 : vector<2x32xf32>
    %cst_110 = arith.constant 5.000000e-01 : f32
    %264 = vector.broadcast %cst_110 : f32 to vector<2x32xf32>
    %265 = arith.addf %263, %264 : vector<2x32xf32>
    %266 = vector.extract_strided_slice %249 {offsets = [0, 64], sizes = [2, 32], strides = [1, 1]} : vector<2x128xf32> to vector<2x32xf32>
    %267 = math.tanh %266 : vector<2x32xf32>
    %268 = vector.extract_strided_slice %249 {offsets = [0, 96], sizes = [2, 32], strides = [1, 1]} : vector<2x128xf32> to vector<2x32xf32>
    %cst_111 = arith.constant 5.000000e-01 : f32
    %269 = vector.broadcast %cst_111 : f32 to vector<2x32xf32>
    %270 = arith.mulf %269, %268 : vector<2x32xf32>
    %271 = math.tanh %270 : vector<2x32xf32>
    %cst_112 = arith.constant 5.000000e-01 : f32
    %272 = vector.broadcast %cst_112 : f32 to vector<2x32xf32>
    %273 = arith.mulf %272, %271 : vector<2x32xf32>
    %cst_113 = arith.constant 5.000000e-01 : f32
    %274 = vector.broadcast %cst_113 : f32 to vector<2x32xf32>
    %275 = arith.addf %273, %274 : vector<2x32xf32>
    %276 = arith.mulf %265, %224 : vector<2x32xf32>
    %277 = arith.mulf %257, %267 : vector<2x32xf32>
    %278 = arith.addf %276, %277 : vector<2x32xf32>
    %279 = math.tanh %278 : vector<2x32xf32>
    %280 = arith.mulf %275, %279 : vector<2x32xf32>
    %cst_114 = arith.constant dense<0.000000e+00> : vector<2x128xf32>
    %281 = tpu.matmul %280, %7, %cst_114 {dimension_numbers = #tpu.dot_dimension_numbers<[1], [0], [0], [1], [0, 0, 1, 1], [], []>} : vector<2x32xf32>, vector<32x128xf32>, vector<2x128xf32> -> vector<2x128xf32>
    %282 = vector.broadcast %8 : vector<1x128xf32> to vector<2x128xf32>
    %283 = arith.addf %281, %282 : vector<2x128xf32>
    %c0_115 = arith.constant 0 : index
    %c4 = arith.constant 4 : index
    %c0_116 = arith.constant 0 : index
    %284 = vector.load %arg13[%c0_115, %c4, %c0_116] : memref<2x8x128xf32, #tpu.memory_space<vmem>>, vector<2x1x128xf32>
    %285 = vector.shape_cast %284 : vector<2x1x128xf32> to vector<2x128xf32>
    %286 = vector.shape_cast %283 : vector<2x128xf32> to vector<2x1x128xf32>
    tpu.vector_store %arg13[%c0_115, %c4, %c0_116], %286 {strides = array<i32>} : memref<2x8x128xf32, #tpu.memory_space<vmem>>, vector<2x1x128xf32>,
    %287 = vector.extract_strided_slice %16 {offsets = [0, 5, 0], sizes = [2, 1, 32], strides = [1, 1, 1]} : vector<2x8x32xf32> to vector<2x1x32xf32>
    %288 = vector.shape_cast %287 : vector<2x1x32xf32> to vector<2x32xf32>
    %cst_117 = arith.constant dense<0.000000e+00> : vector<2x32xf32>
    %289 = tpu.matmul %288, %3, %cst_117 {dimension_numbers = #tpu.dot_dimension_numbers<[1], [0], [0], [1], [0, 0, 1, 1], [], []>} : vector<2x32xf32>, vector<32x32xf32>, vector<2x32xf32> -> vector<2x32xf32>
    %290 = vector.broadcast %4 : vector<1x32xf32> to vector<2x32xf32>
    %291 = arith.addf %289, %290 : vector<2x32xf32>
    %cst_118 = arith.constant 0.000000e+00 : f32
    %292 = vector.broadcast %cst_118 : f32 to vector<2x32xf32>
    %293 = arith.maximumf %291, %292 : vector<2x32xf32>
    %cst_119 = arith.constant dense<0.000000e+00> : vector<2x16xf32>
    %294 = tpu.matmul %293, %5, %cst_119 {dimension_numbers = #tpu.dot_dimension_numbers<[1], [0], [0], [1], [0, 0, 1, 1], [], []>} : vector<2x32xf32>, vector<32x16xf32>, vector<2x16xf32> -> vector<2x16xf32>
    %295 = vector.broadcast %6 : vector<1x16xf32> to vector<2x16xf32>
    %296 = arith.addf %294, %295 : vector<2x16xf32>
    %cst_120 = arith.constant 0.000000e+00 : f32
    %297 = vector.broadcast %cst_120 : f32 to vector<2x16xf32>
    %298 = arith.maximumf %296, %297 : vector<2x16xf32>
    %cst_121 = arith.constant dense<0.000000e+00> : vector<2x128xf32>
    %299 = tpu.matmul %298, %9, %cst_121 {dimension_numbers = #tpu.dot_dimension_numbers<[1], [0], [0], [1], [0, 0, 1, 1], [], []>} : vector<2x16xf32>, vector<16x128xf32>, vector<2x128xf32> -> vector<2x128xf32>
    %cst_122 = arith.constant dense<0.000000e+00> : vector<2x128xf32>
    %300 = tpu.matmul %280, %10, %cst_122 {dimension_numbers = #tpu.dot_dimension_numbers<[1], [0], [0], [1], [0, 0, 1, 1], [], []>} : vector<2x32xf32>, vector<32x128xf32>, vector<2x128xf32> -> vector<2x128xf32>
    %301 = arith.addf %299, %300 : vector<2x128xf32>
    %302 = vector.broadcast %11 : vector<1x128xf32> to vector<2x128xf32>
    %303 = arith.addf %301, %302 : vector<2x128xf32>
    %304 = vector.extract_strided_slice %303 {offsets = [0, 0], sizes = [2, 32], strides = [1, 1]} : vector<2x128xf32> to vector<2x32xf32>
    %cst_123 = arith.constant 5.000000e-01 : f32
    %305 = vector.broadcast %cst_123 : f32 to vector<2x32xf32>
    %306 = arith.mulf %305, %304 : vector<2x32xf32>
    %307 = math.tanh %306 : vector<2x32xf32>
    %cst_124 = arith.constant 5.000000e-01 : f32
    %308 = vector.broadcast %cst_124 : f32 to vector<2x32xf32>
    %309 = arith.mulf %308, %307 : vector<2x32xf32>
    %cst_125 = arith.constant 5.000000e-01 : f32
    %310 = vector.broadcast %cst_125 : f32 to vector<2x32xf32>
    %311 = arith.addf %309, %310 : vector<2x32xf32>
    %312 = vector.extract_strided_slice %303 {offsets = [0, 32], sizes = [2, 32], strides = [1, 1]} : vector<2x128xf32> to vector<2x32xf32>
    %cst_126 = arith.constant 5.000000e-01 : f32
    %313 = vector.broadcast %cst_126 : f32 to vector<2x32xf32>
    %314 = arith.mulf %313, %312 : vector<2x32xf32>
    %315 = math.tanh %314 : vector<2x32xf32>
    %cst_127 = arith.constant 5.000000e-01 : f32
    %316 = vector.broadcast %cst_127 : f32 to vector<2x32xf32>
    %317 = arith.mulf %316, %315 : vector<2x32xf32>
    %cst_128 = arith.constant 5.000000e-01 : f32
    %318 = vector.broadcast %cst_128 : f32 to vector<2x32xf32>
    %319 = arith.addf %317, %318 : vector<2x32xf32>
    %320 = vector.extract_strided_slice %303 {offsets = [0, 64], sizes = [2, 32], strides = [1, 1]} : vector<2x128xf32> to vector<2x32xf32>
    %321 = math.tanh %320 : vector<2x32xf32>
    %322 = vector.extract_strided_slice %303 {offsets = [0, 96], sizes = [2, 32], strides = [1, 1]} : vector<2x128xf32> to vector<2x32xf32>
    %cst_129 = arith.constant 5.000000e-01 : f32
    %323 = vector.broadcast %cst_129 : f32 to vector<2x32xf32>
    %324 = arith.mulf %323, %322 : vector<2x32xf32>
    %325 = math.tanh %324 : vector<2x32xf32>
    %cst_130 = arith.constant 5.000000e-01 : f32
    %326 = vector.broadcast %cst_130 : f32 to vector<2x32xf32>
    %327 = arith.mulf %326, %325 : vector<2x32xf32>
    %cst_131 = arith.constant 5.000000e-01 : f32
    %328 = vector.broadcast %cst_131 : f32 to vector<2x32xf32>
    %329 = arith.addf %327, %328 : vector<2x32xf32>
    %330 = arith.mulf %319, %278 : vector<2x32xf32>
    %331 = arith.mulf %311, %321 : vector<2x32xf32>
    %332 = arith.addf %330, %331 : vector<2x32xf32>
    %333 = math.tanh %332 : vector<2x32xf32>
    %334 = arith.mulf %329, %333 : vector<2x32xf32>
    %cst_132 = arith.constant dense<0.000000e+00> : vector<2x128xf32>
    %335 = tpu.matmul %334, %7, %cst_132 {dimension_numbers = #tpu.dot_dimension_numbers<[1], [0], [0], [1], [0, 0, 1, 1], [], []>} : vector<2x32xf32>, vector<32x128xf32>, vector<2x128xf32> -> vector<2x128xf32>
    %336 = vector.broadcast %8 : vector<1x128xf32> to vector<2x128xf32>
    %337 = arith.addf %335, %336 : vector<2x128xf32>
    %c0_133 = arith.constant 0 : index
    %c5 = arith.constant 5 : index
    %c0_134 = arith.constant 0 : index
    %338 = vector.load %arg13[%c0_133, %c5, %c0_134] : memref<2x8x128xf32, #tpu.memory_space<vmem>>, vector<2x1x128xf32>
    %339 = vector.shape_cast %338 : vector<2x1x128xf32> to vector<2x128xf32>
    %340 = vector.shape_cast %337 : vector<2x128xf32> to vector<2x1x128xf32>
    tpu.vector_store %arg13[%c0_133, %c5, %c0_134], %340 {strides = array<i32>} : memref<2x8x128xf32, #tpu.memory_space<vmem>>, vector<2x1x128xf32>,
    %341 = vector.extract_strided_slice %16 {offsets = [0, 6, 0], sizes = [2, 1, 32], strides = [1, 1, 1]} : vector<2x8x32xf32> to vector<2x1x32xf32>
    %342 = vector.shape_cast %341 : vector<2x1x32xf32> to vector<2x32xf32>
    %cst_135 = arith.constant dense<0.000000e+00> : vector<2x32xf32>
    %343 = tpu.matmul %342, %3, %cst_135 {dimension_numbers = #tpu.dot_dimension_numbers<[1], [0], [0], [1], [0, 0, 1, 1], [], []>} : vector<2x32xf32>, vector<32x32xf32>, vector<2x32xf32> -> vector<2x32xf32>
    %344 = vector.broadcast %4 : vector<1x32xf32> to vector<2x32xf32>
    %345 = arith.addf %343, %344 : vector<2x32xf32>
    %cst_136 = arith.constant 0.000000e+00 : f32
    %346 = vector.broadcast %cst_136 : f32 to vector<2x32xf32>
    %347 = arith.maximumf %345, %346 : vector<2x32xf32>
    %cst_137 = arith.constant dense<0.000000e+00> : vector<2x16xf32>
    %348 = tpu.matmul %347, %5, %cst_137 {dimension_numbers = #tpu.dot_dimension_numbers<[1], [0], [0], [1], [0, 0, 1, 1], [], []>} : vector<2x32xf32>, vector<32x16xf32>, vector<2x16xf32> -> vector<2x16xf32>
    %349 = vector.broadcast %6 : vector<1x16xf32> to vector<2x16xf32>
    %350 = arith.addf %348, %349 : vector<2x16xf32>
    %cst_138 = arith.constant 0.000000e+00 : f32
    %351 = vector.broadcast %cst_138 : f32 to vector<2x16xf32>
    %352 = arith.maximumf %350, %351 : vector<2x16xf32>
    %cst_139 = arith.constant dense<0.000000e+00> : vector<2x128xf32>
    %353 = tpu.matmul %352, %9, %cst_139 {dimension_numbers = #tpu.dot_dimension_numbers<[1], [0], [0], [1], [0, 0, 1, 1], [], []>} : vector<2x16xf32>, vector<16x128xf32>, vector<2x128xf32> -> vector<2x128xf32>
    %cst_140 = arith.constant dense<0.000000e+00> : vector<2x128xf32>
    %354 = tpu.matmul %334, %10, %cst_140 {dimension_numbers = #tpu.dot_dimension_numbers<[1], [0], [0], [1], [0, 0, 1, 1], [], []>} : vector<2x32xf32>, vector<32x128xf32>, vector<2x128xf32> -> vector<2x128xf32>
    %355 = arith.addf %353, %354 : vector<2x128xf32>
    %356 = vector.broadcast %11 : vector<1x128xf32> to vector<2x128xf32>
    %357 = arith.addf %355, %356 : vector<2x128xf32>
    %358 = vector.extract_strided_slice %357 {offsets = [0, 0], sizes = [2, 32], strides = [1, 1]} : vector<2x128xf32> to vector<2x32xf32>
    %cst_141 = arith.constant 5.000000e-01 : f32
    %359 = vector.broadcast %cst_141 : f32 to vector<2x32xf32>
    %360 = arith.mulf %359, %358 : vector<2x32xf32>
    %361 = math.tanh %360 : vector<2x32xf32>
    %cst_142 = arith.constant 5.000000e-01 : f32
    %362 = vector.broadcast %cst_142 : f32 to vector<2x32xf32>
    %363 = arith.mulf %362, %361 : vector<2x32xf32>
    %cst_143 = arith.constant 5.000000e-01 : f32
    %364 = vector.broadcast %cst_143 : f32 to vector<2x32xf32>
    %365 = arith.addf %363, %364 : vector<2x32xf32>
    %366 = vector.extract_strided_slice %357 {offsets = [0, 32], sizes = [2, 32], strides = [1, 1]} : vector<2x128xf32> to vector<2x32xf32>
    %cst_144 = arith.constant 5.000000e-01 : f32
    %367 = vector.broadcast %cst_144 : f32 to vector<2x32xf32>
    %368 = arith.mulf %367, %366 : vector<2x32xf32>
    %369 = math.tanh %368 : vector<2x32xf32>
    %cst_145 = arith.constant 5.000000e-01 : f32
    %370 = vector.broadcast %cst_145 : f32 to vector<2x32xf32>
    %371 = arith.mulf %370, %369 : vector<2x32xf32>
    %cst_146 = arith.constant 5.000000e-01 : f32
    %372 = vector.broadcast %cst_146 : f32 to vector<2x32xf32>
    %373 = arith.addf %371, %372 : vector<2x32xf32>
    %374 = vector.extract_strided_slice %357 {offsets = [0, 64], sizes = [2, 32], strides = [1, 1]} : vector<2x128xf32> to vector<2x32xf32>
    %375 = math.tanh %374 : vector<2x32xf32>
    %376 = vector.extract_strided_slice %357 {offsets = [0, 96], sizes = [2, 32], strides = [1, 1]} : vector<2x128xf32> to vector<2x32xf32>
    %cst_147 = arith.constant 5.000000e-01 : f32
    %377 = vector.broadcast %cst_147 : f32 to vector<2x32xf32>
    %378 = arith.mulf %377, %376 : vector<2x32xf32>
    %379 = math.tanh %378 : vector<2x32xf32>
    %cst_148 = arith.constant 5.000000e-01 : f32
    %380 = vector.broadcast %cst_148 : f32 to vector<2x32xf32>
    %381 = arith.mulf %380, %379 : vector<2x32xf32>
    %cst_149 = arith.constant 5.000000e-01 : f32
    %382 = vector.broadcast %cst_149 : f32 to vector<2x32xf32>
    %383 = arith.addf %381, %382 : vector<2x32xf32>
    %384 = arith.mulf %373, %332 : vector<2x32xf32>
    %385 = arith.mulf %365, %375 : vector<2x32xf32>
    %386 = arith.addf %384, %385 : vector<2x32xf32>
    %387 = math.tanh %386 : vector<2x32xf32>
    %388 = arith.mulf %383, %387 : vector<2x32xf32>
    %cst_150 = arith.constant dense<0.000000e+00> : vector<2x128xf32>
    %389 = tpu.matmul %388, %7, %cst_150 {dimension_numbers = #tpu.dot_dimension_numbers<[1], [0], [0], [1], [0, 0, 1, 1], [], []>} : vector<2x32xf32>, vector<32x128xf32>, vector<2x128xf32> -> vector<2x128xf32>
    %390 = vector.broadcast %8 : vector<1x128xf32> to vector<2x128xf32>
    %391 = arith.addf %389, %390 : vector<2x128xf32>
    %c0_151 = arith.constant 0 : index
    %c6 = arith.constant 6 : index
    %c0_152 = arith.constant 0 : index
    %392 = vector.load %arg13[%c0_151, %c6, %c0_152] : memref<2x8x128xf32, #tpu.memory_space<vmem>>, vector<2x1x128xf32>
    %393 = vector.shape_cast %392 : vector<2x1x128xf32> to vector<2x128xf32>
    %394 = vector.shape_cast %391 : vector<2x128xf32> to vector<2x1x128xf32>
    tpu.vector_store %arg13[%c0_151, %c6, %c0_152], %394 {strides = array<i32>} : memref<2x8x128xf32, #tpu.memory_space<vmem>>, vector<2x1x128xf32>,
    %395 = vector.extract_strided_slice %16 {offsets = [0, 7, 0], sizes = [2, 1, 32], strides = [1, 1, 1]} : vector<2x8x32xf32> to vector<2x1x32xf32>
    %396 = vector.shape_cast %395 : vector<2x1x32xf32> to vector<2x32xf32>
    %cst_153 = arith.constant dense<0.000000e+00> : vector<2x32xf32>
    %397 = tpu.matmul %396, %3, %cst_153 {dimension_numbers = #tpu.dot_dimension_numbers<[1], [0], [0], [1], [0, 0, 1, 1], [], []>} : vector<2x32xf32>, vector<32x32xf32>, vector<2x32xf32> -> vector<2x32xf32>
    %398 = vector.broadcast %4 : vector<1x32xf32> to vector<2x32xf32>
    %399 = arith.addf %397, %398 : vector<2x32xf32>
    %cst_154 = arith.constant 0.000000e+00 : f32
    %400 = vector.broadcast %cst_154 : f32 to vector<2x32xf32>
    %401 = arith.maximumf %399, %400 : vector<2x32xf32>
    %cst_155 = arith.constant dense<0.000000e+00> : vector<2x16xf32>
    %402 = tpu.matmul %401, %5, %cst_155 {dimension_numbers = #tpu.dot_dimension_numbers<[1], [0], [0], [1], [0, 0, 1, 1], [], []>} : vector<2x32xf32>, vector<32x16xf32>, vector<2x16xf32> -> vector<2x16xf32>
    %403 = vector.broadcast %6 : vector<1x16xf32> to vector<2x16xf32>
    %404 = arith.addf %402, %403 : vector<2x16xf32>
    %cst_156 = arith.constant 0.000000e+00 : f32
    %405 = vector.broadcast %cst_156 : f32 to vector<2x16xf32>
    %406 = arith.maximumf %404, %405 : vector<2x16xf32>
    %cst_157 = arith.constant dense<0.000000e+00> : vector<2x128xf32>
    %407 = tpu.matmul %406, %9, %cst_157 {dimension_numbers = #tpu.dot_dimension_numbers<[1], [0], [0], [1], [0, 0, 1, 1], [], []>} : vector<2x16xf32>, vector<16x128xf32>, vector<2x128xf32> -> vector<2x128xf32>
    %cst_158 = arith.constant dense<0.000000e+00> : vector<2x128xf32>
    %408 = tpu.matmul %388, %10, %cst_158 {dimension_numbers = #tpu.dot_dimension_numbers<[1], [0], [0], [1], [0, 0, 1, 1], [], []>} : vector<2x32xf32>, vector<32x128xf32>, vector<2x128xf32> -> vector<2x128xf32>
    %409 = arith.addf %407, %408 : vector<2x128xf32>
    %410 = vector.broadcast %11 : vector<1x128xf32> to vector<2x128xf32>
    %411 = arith.addf %409, %410 : vector<2x128xf32>
    %412 = vector.extract_strided_slice %411 {offsets = [0, 0], sizes = [2, 32], strides = [1, 1]} : vector<2x128xf32> to vector<2x32xf32>
    %cst_159 = arith.constant 5.000000e-01 : f32
    %413 = vector.broadcast %cst_159 : f32 to vector<2x32xf32>
    %414 = arith.mulf %413, %412 : vector<2x32xf32>
    %415 = math.tanh %414 : vector<2x32xf32>
    %cst_160 = arith.constant 5.000000e-01 : f32
    %416 = vector.broadcast %cst_160 : f32 to vector<2x32xf32>
    %417 = arith.mulf %416, %415 : vector<2x32xf32>
    %cst_161 = arith.constant 5.000000e-01 : f32
    %418 = vector.broadcast %cst_161 : f32 to vector<2x32xf32>
    %419 = arith.addf %417, %418 : vector<2x32xf32>
    %420 = vector.extract_strided_slice %411 {offsets = [0, 32], sizes = [2, 32], strides = [1, 1]} : vector<2x128xf32> to vector<2x32xf32>
    %cst_162 = arith.constant 5.000000e-01 : f32
    %421 = vector.broadcast %cst_162 : f32 to vector<2x32xf32>
    %422 = arith.mulf %421, %420 : vector<2x32xf32>
    %423 = math.tanh %422 : vector<2x32xf32>
    %cst_163 = arith.constant 5.000000e-01 : f32
    %424 = vector.broadcast %cst_163 : f32 to vector<2x32xf32>
    %425 = arith.mulf %424, %423 : vector<2x32xf32>
    %cst_164 = arith.constant 5.000000e-01 : f32
    %426 = vector.broadcast %cst_164 : f32 to vector<2x32xf32>
    %427 = arith.addf %425, %426 : vector<2x32xf32>
    %428 = vector.extract_strided_slice %411 {offsets = [0, 64], sizes = [2, 32], strides = [1, 1]} : vector<2x128xf32> to vector<2x32xf32>
    %429 = math.tanh %428 : vector<2x32xf32>
    %430 = vector.extract_strided_slice %411 {offsets = [0, 96], sizes = [2, 32], strides = [1, 1]} : vector<2x128xf32> to vector<2x32xf32>
    %cst_165 = arith.constant 5.000000e-01 : f32
    %431 = vector.broadcast %cst_165 : f32 to vector<2x32xf32>
    %432 = arith.mulf %431, %430 : vector<2x32xf32>
    %433 = math.tanh %432 : vector<2x32xf32>
    %cst_166 = arith.constant 5.000000e-01 : f32
    %434 = vector.broadcast %cst_166 : f32 to vector<2x32xf32>
    %435 = arith.mulf %434, %433 : vector<2x32xf32>
    %cst_167 = arith.constant 5.000000e-01 : f32
    %436 = vector.broadcast %cst_167 : f32 to vector<2x32xf32>
    %437 = arith.addf %435, %436 : vector<2x32xf32>
    %438 = arith.mulf %427, %386 : vector<2x32xf32>
    %439 = arith.mulf %419, %429 : vector<2x32xf32>
    %440 = arith.addf %438, %439 : vector<2x32xf32>
    %441 = math.tanh %440 : vector<2x32xf32>
    %442 = arith.mulf %437, %441 : vector<2x32xf32>
    %cst_168 = arith.constant dense<0.000000e+00> : vector<2x128xf32>
    %443 = tpu.matmul %442, %7, %cst_168 {dimension_numbers = #tpu.dot_dimension_numbers<[1], [0], [0], [1], [0, 0, 1, 1], [], []>} : vector<2x32xf32>, vector<32x128xf32>, vector<2x128xf32> -> vector<2x128xf32>
    %444 = vector.broadcast %8 : vector<1x128xf32> to vector<2x128xf32>
    %445 = arith.addf %443, %444 : vector<2x128xf32>
    %c0_169 = arith.constant 0 : index
    %c7 = arith.constant 7 : index
    %c0_170 = arith.constant 0 : index
    %446 = vector.load %arg13[%c0_169, %c7, %c0_170] : memref<2x8x128xf32, #tpu.memory_space<vmem>>, vector<2x1x128xf32>
    %447 = vector.shape_cast %446 : vector<2x1x128xf32> to vector<2x128xf32>
    %448 = vector.shape_cast %445 : vector<2x128xf32> to vector<2x1x128xf32>
    tpu.vector_store %arg13[%c0_169, %c7, %c0_170], %448 {strides = array<i32>} : memref<2x8x128xf32, #tpu.memory_space<vmem>>, vector<2x1x128xf32>,
    %c0_171 = arith.constant 0 : index
    %c0_172 = arith.constant 0 : index
    %c0_173 = arith.constant 0 : index
    %449 = vector.load %arg16[%c0_171, %c0_172, %c0_173] : memref<1x2x32xf32, #tpu.memory_space<vmem>>, vector<1x2x32xf32>
    %450 = vector.shape_cast %449 : vector<1x2x32xf32> to vector<2x32xf32>
    %451 = vector.shape_cast %442 : vector<2x32xf32> to vector<1x2x32xf32>
    tpu.vector_store %arg16[%c0_171, %c0_172, %c0_173], %451 {strides = array<i32>} : memref<1x2x32xf32, #tpu.memory_space<vmem>>, vector<1x2x32xf32>,
    %c0_174 = arith.constant 0 : index
    %c0_175 = arith.constant 0 : index
    %c0_176 = arith.constant 0 : index
    %452 = vector.load %arg17[%c0_174, %c0_175, %c0_176] : memref<1x2x32xf32, #tpu.memory_space<vmem>>, vector<1x2x32xf32>
    %453 = vector.shape_cast %452 : vector<1x2x32xf32> to vector<2x32xf32>
    %454 = vector.shape_cast %440 : vector<2x32xf32> to vector<1x2x32xf32>
    tpu.vector_store %arg17[%c0_174, %c0_175, %c0_176], %454 {strides = array<i32>} : memref<1x2x32xf32, #tpu.memory_space<vmem>>, vector<1x2x32xf32>,
    %c0_i32_177 = arith.constant 0 : i32
    %455 = arith.cmpi eq, %arg0, %c0_i32_177 : i32
    %456 = arith.extui %455 : i1 to i32
    %c0_i32_178 = arith.constant 0 : i32
    %457 = arith.cmpi ne, %456, %c0_i32_178 : i32
    scf.if %457 {
      %c0_179 = arith.constant 0 : index
      %c0_180 = arith.constant 0 : index
      %c0_181 = arith.constant 0 : index
      %458 = vector.load %arg14[%c0_179, %c0_180, %c0_181] : memref<1x2x32xf32, #tpu.memory_space<vmem>>, vector<1x2x32xf32>
      %459 = vector.shape_cast %458 : vector<1x2x32xf32> to vector<2x32xf32>
      %460 = vector.shape_cast %442 : vector<2x32xf32> to vector<1x2x32xf32>
      tpu.vector_store %arg14[%c0_179, %c0_180, %c0_181], %460 {strides = array<i32>} : memref<1x2x32xf32, #tpu.memory_space<vmem>>, vector<1x2x32xf32>,
      %c0_182 = arith.constant 0 : index
      %c0_183 = arith.constant 0 : index
      %c0_184 = arith.constant 0 : index
      %461 = vector.load %arg15[%c0_182, %c0_183, %c0_184] : memref<1x2x32xf32, #tpu.memory_space<vmem>>, vector<1x2x32xf32>
      %462 = vector.shape_cast %461 : vector<1x2x32xf32> to vector<2x32xf32>
      %463 = vector.shape_cast %440 : vector<2x32xf32> to vector<1x2x32xf32>
      tpu.vector_store %arg15[%c0_182, %c0_183, %c0_184], %463 {strides = array<i32>} : memref<1x2x32xf32, #tpu.memory_space<vmem>>, vector<1x2x32xf32>,
    } else {
    }
    return
  }
  func.func @transform_0(%arg0: i32) -> (i32, i32, i32) {
    %c0_i32 = arith.constant 0 : i32
    %c0_i32_0 = arith.constant 0 : i32
    %c0_i32_1 = arith.constant 0 : i32
    return %c0_i32, %arg0, %c0_i32_0 : i32, i32, i32
  }
  func.func @transform_1(%arg0: i32) -> (i32, i32) {
    %c0_i32 = arith.constant 0 : i32
    %c0_i32_0 = arith.constant 0 : i32
    %c0_i32_1 = arith.constant 0 : i32
    return %c0_i32, %c0_i32_0 : i32, i32
  }
  func.func @transform_2(%arg0: i32) -> (i32, i32) {
    %c0_i32 = arith.constant 0 : i32
    %c0_i32_0 = arith.constant 0 : i32
    %c0_i32_1 = arith.constant 0 : i32
    return %c0_i32, %c0_i32_0 : i32, i32
  }
  func.func @transform_3(%arg0: i32) -> (i32, i32) {
    %c0_i32 = arith.constant 0 : i32
    %c0_i32_0 = arith.constant 0 : i32
    %c0_i32_1 = arith.constant 0 : i32
    return %c0_i32, %c0_i32_0 : i32, i32
  }
  func.func @transform_4(%arg0: i32) -> (i32, i32) {
    %c0_i32 = arith.constant 0 : i32
    %c0_i32_0 = arith.constant 0 : i32
    %c0_i32_1 = arith.constant 0 : i32
    return %c0_i32, %c0_i32_0 : i32, i32
  }
  func.func @transform_5(%arg0: i32) -> (i32, i32) {
    %c0_i32 = arith.constant 0 : i32
    %c0_i32_0 = arith.constant 0 : i32
    %c0_i32_1 = arith.constant 0 : i32
    return %c0_i32, %c0_i32_0 : i32, i32
  }
  func.func @transform_6(%arg0: i32) -> (i32, i32) {
    %c0_i32 = arith.constant 0 : i32
    %c0_i32_0 = arith.constant 0 : i32
    %c0_i32_1 = arith.constant 0 : i32
    return %c0_i32, %c0_i32_0 : i32, i32
  }
  func.func @transform_7(%arg0: i32) -> (i32, i32) {
    %c0_i32 = arith.constant 0 : i32
    %c0_i32_0 = arith.constant 0 : i32
    %c0_i32_1 = arith.constant 0 : i32
    return %c0_i32, %c0_i32_0 : i32, i32
  }
  func.func @transform_8(%arg0: i32) -> (i32, i32) {
    %c0_i32 = arith.constant 0 : i32
    %c0_i32_0 = arith.constant 0 : i32
    %c0_i32_1 = arith.constant 0 : i32
    return %c0_i32, %c0_i32_0 : i32, i32
  }
  func.func @transform_9(%arg0: i32) -> (i32, i32) {
    %c0_i32 = arith.constant 0 : i32
    %c0_i32_0 = arith.constant 0 : i32
    %c0_i32_1 = arith.constant 0 : i32
    return %c0_i32, %c0_i32_0 : i32, i32
  }
  func.func @transform_10(%arg0: i32) -> (i32, i32, i32) {
    %c0_i32 = arith.constant 0 : i32
    %c0_i32_0 = arith.constant 0 : i32
    %c0_i32_1 = arith.constant 0 : i32
    %c0_i32_2 = arith.constant 0 : i32
    return %c0_i32, %c0_i32_0, %c0_i32_1 : i32, i32, i32
  }
  func.func @transform_11(%arg0: i32) -> (i32, i32, i32) {
    %c0_i32 = arith.constant 0 : i32
    %c0_i32_0 = arith.constant 0 : i32
    %c0_i32_1 = arith.constant 0 : i32
    %c0_i32_2 = arith.constant 0 : i32
    return %c0_i32, %c0_i32_0, %c0_i32_1 : i32, i32, i32
  }
  func.func @transform_12(%arg0: i32) -> (i32, i32, i32) {
    %c0_i32 = arith.constant 0 : i32
    %c0_i32_0 = arith.constant 0 : i32
    %c0_i32_1 = arith.constant 0 : i32
    return %c0_i32, %arg0, %c0_i32_0 : i32, i32, i32
  }
  func.func @transform_13(%arg0: i32) -> (i32, i32, i32) {
    %c0_i32 = arith.constant 0 : i32
    %c0_i32_0 = arith.constant 0 : i32
    %c0_i32_1 = arith.constant 0 : i32
    %c0_i32_2 = arith.constant 0 : i32
    return %c0_i32, %c0_i32_0, %c0_i32_1 : i32, i32, i32
  }
  func.func @transform_14(%arg0: i32) -> (i32, i32, i32) {
    %c0_i32 = arith.constant 0 : i32
    %c0_i32_0 = arith.constant 0 : i32
    %c0_i32_1 = arith.constant 0 : i32
    %c0_i32_2 = arith.constant 0 : i32
    return %c0_i32, %c0_i32_0, %c0_i32_1 : i32, i32, i32
  }
}

</mosaic_0001>

<bundles_post_ra>
// kernel: tpu_custom_call.1
= control target key start
LH: loop header
LB: loop body
LE: loop exit
PB: predicated region body
PF: predicated region fallthrough
CT: control target
= control target key end

     0   :  { %20 = vsyncpa [#allocation5], 0  ;;  %s5375_s0 = inlined_call_operand.hbm [shape: f32[2,8,32], index: 0, kind: input, shape index: {}]   ;;  %s5376_s1 = inlined_call_operand.vmem [shape: f32[32,32], index: 1, kind: input, shape index: {}]   ;;  %s5377_s2 = inlined_call_operand.hbm [shape: f32[1,32], index: 2, kind: input, shape index: {}]   ;;  %s5378_s3 = inlined_call_operand.vmem [shape: f32[32,16], index: 3, kind: input, shape index: {}]   ;;  %s5379_s4 = inlined_call_operand.hbm [shape: f32[1,16], index: 4, kind: input, shape index: {}]   ;;  %s5380_s5 = inlined_call_operand.hbm [shape: f32[16,128], index: 5, kind: input, shape index: {}]   ;;  %s5381_s6 = inlined_call_operand.vmem [shape: f32[32,128], index: 6, kind: input, shape index: {}]   ;;  %s5382_s7 = inlined_call_operand.vmem [shape: f32[1,128], index: 7, kind: input, shape index: {}]   ;;  %s5383_s8 = inlined_call_operand.hbm [shape: f32[32,128], index: 8, kind: input, shape index: {}]   ;;  %s5384_s9 = inlined_call_operand.vmem [shape: f32[1,128], index: 9, kind: input, shape index: {}]   ;;  %s5385_s10 = inlined_call_operand.vmem [shape: f32[1,2,32], index: 10, kind: input, shape index: {}]   ;;  %s5386_s11 = inlined_call_operand.vmem [shape: f32[1,2,32], index: 11, kind: input, shape index: {}]   ;;  %s5387_s12 = inlined_call_operand.hbm [shape: f32[2,8,128], index: 12, kind: output, shape index: {0}]   ;;  %s5388_s13 = inlined_call_operand.hbm [shape: f32[1,2,32], index: 13, kind: output, shape index: {1}]   ;;  %s5389_s14 = inlined_call_operand.hbm [shape: f32[1,2,32], index: 14, kind: output, shape index: {2}]  }
   0x1   :  { %21 = vsyncpa [#allocation8], 0 }
   0x2   :  { %22 = vsyncpa [#allocation11], 0 }
   0x3   :  { %23 = vsyncpa [#allocation6], 0 }
   0x4   :  { %24 = vsyncpa [#allocation15], 0  ;;  %s4706_s29 = smov [#allocation7]   ;;  %s4520_s17 = scalar_lea.hbm %s5377_s2, 16 }
   0x5   :  { %s45_s30 = sshll.u32 %s4706_s29, 4  ;;  %p4521_p0 = scmp.ne.s32.totalorder %s5377_s2, %s4520_s17  ;;  %s46_s30 = int_to_ptr.vmem [resolvable:$true] %s45_s30 }
   0x6   :  { %p4524_p1 = scmp.lt.u32.totalorder %s4520_s17, %s5377_s2 }
   0x8   :  { %p4526_p2 = pnand %p4524_p1, %p4521_p0 }
   0xa   :  { %4529 = shalt.err (!%p4526_p2)
}
   0xb   :  { %s4530_s22 = scalar_lea.vmem %s46_s30, 16  ;;  %s4534_s23 = scalar_lea.vmem %s46_s30, 32 }
   0xc   :  { %p4531_p3 = scmp.ne.s32.totalorder %s46_s30, %s4530_s22  ;;  %p4535_p4 = scmp.lt.s32.totalorder %s46_s30, %s46_s30 }
   0xd   :  { %p4536_p5 = scmp.lt.s32.totalorder %s4534_s23, %s4530_s22 }
   0xf   :  { %p4537_p6 = por %p4536_p5, %p4535_p4 }
  0x11   :  { %p4538_p7 = pnand %p4537_p6, %p4531_p3 }
  0x13   :  { %4541 = shalt.err (!%p4538_p7)
}
  0x14   :  { %48 = dma.hbm_to_vmem [thread:$0]  %s5377_s2, 16, %s46_s30, [#allocation8]  }
  0x15   :  { %s4707_s26 = smov [#allocation10]   ;;  %s4708_s28 = smov [#allocation4]  }
  0x16   :  { %s66_s27 = sshll.u32 %s4707_s26, 4  ;;  %s30_s29 = sshll.u32 %s4708_s28, 4  ;;  %s67_s27 = int_to_ptr.vmem [resolvable:$true] %s66_s27  ;;  %s31_s29 = int_to_ptr.vmem [resolvable:$true] %s30_s29 }
  0x17   :  { %s4542_s17 = scalar_lea.hbm %s5380_s5, 256 }
  0x18   :  { %p4543_p8 = scmp.ne.s32.totalorder %s5380_s5, %s4542_s17  ;;  %p4546_p9 = scmp.lt.u32.totalorder %s4542_s17, %s5380_s5 }
  0x1a   :  { %p4548_p10 = pnand %p4546_p9, %p4543_p8 }
  0x1c   :  { %4551 = shalt.err (!%p4548_p10)
}
  0x1d   :  { %s4552_s2 = scalar_lea.vmem %s67_s27, 256  ;;  %p4557_p12 = scmp.lt.s32.totalorder %s67_s27, %s67_s27 }
  0x1e   :  { %p4553_p11 = scmp.ne.s32.totalorder %s67_s27, %s4552_s2  ;;  %p4558_p13 = scmp.lt.s32.totalorder %s4552_s2, %s4552_s2 }
  0x20   :  { %p4559_p0 = por %p4558_p13, %p4557_p12 }
  0x22   :  { %p4560_p1 = pnand %p4559_p0, %p4553_p11 }
  0x24   :  { %4563 = shalt.err (!%p4560_p1)
}
  0x25   :  { %s4709_s30 = smov 128   ;;  %s4710_s22 = smov 8  }
  0x26   :  { %72 = dma.hbm_to_vmem [thread:$0]  %s5380_s5, 256, %s67_s27, [#allocation11], %s4709_s30, %s4709_s30, %s4710_s22  }
  0x27   :  { %s4564_s28 = scalar_lea.hbm %s5375_s0, 256 }
  0x28   :  { %p4565_p2 = scmp.ne.s32.totalorder %s5375_s0, %s4564_s28  ;;  %p4568_p3 = scmp.lt.u32.totalorder %s4564_s28, %s5375_s0 }
  0x2a   :  { %p4570_p4 = pnand %p4568_p3, %p4565_p2 }
  0x2c   :  { %4573 = shalt.err (!%p4570_p4)
}
  0x2d   :  { %s4574_s19 = scalar_lea.vmem %s31_s29, 256  ;;  %p4579_p6 = scmp.lt.s32.totalorder %s31_s29, %s31_s29 }
  0x2e   :  { %p4575_p5 = scmp.ne.s32.totalorder %s31_s29, %s4574_s19  ;;  %p4580_p7 = scmp.lt.s32.totalorder %s4574_s19, %s4574_s19 }
  0x30   :  { %p4581_p8 = por %p4580_p7, %p4579_p6 }
  0x32   :  { %p4582_p9 = pnand %p4581_p8, %p4575_p5 }
  0x34   :  { %4585 = shalt.err (!%p4582_p9)
}
  0x35   :  { %36 = dma.hbm_to_vmem [thread:$0]  %s5375_s0, 256, %s31_s29, [#allocation5], %s4709_s30, %s4709_s30, %s4710_s22  }
  0x36   :  { %s4711_s20 = smov [#allocation9]   ;;  %s4712_s2 = smov [#allocation12]  }
  0x37   :  { %s57_s21 = sshll.u32 %s4711_s20, 4  ;;  %s82_s23 = sshll.u32 %s4712_s2, 4  ;;  %s58_s21 = int_to_ptr.vmem [resolvable:$true] %s57_s21  ;;  %s83_s23 = int_to_ptr.vmem [resolvable:$true] %s82_s23 }
  0x38   :  { %s4586_s26 = scalar_lea.hbm %s5379_s4, 16 }
  0x39   :  { %p4587_p10 = scmp.ne.s32.totalorder %s5379_s4, %s4586_s26  ;;  %p4590_p11 = scmp.lt.u32.totalorder %s4586_s26, %s5379_s4 }
  0x3b   :  { %p4592_p12 = pnand %p4590_p11, %p4587_p10 }
  0x3d   :  { %4595 = shalt.err (!%p4592_p12)
}
  0x3e   :  { %s4596_s0 = scalar_lea.vmem %s58_s21, 16  ;;  %s4600_s29 = scalar_lea.vmem %s58_s21, 32 }
  0x3f   :  { %p4597_p13 = scmp.ne.s32.totalorder %s58_s21, %s4596_s0  ;;  %p4601_p0 = scmp.lt.s32.totalorder %s58_s21, %s58_s21 }
  0x40   :  { %p4602_p1 = scmp.lt.s32.totalorder %s4600_s29, %s4596_s0 }
  0x42   :  { %p4603_p2 = por %p4602_p1, %p4601_p0 }
  0x44   :  { %p4604_p3 = pnand %p4603_p2, %p4597_p13 }
  0x46   :  { %4607 = shalt.err (!%p4604_p3)
}
  0x47   :  { %60 = dma.hbm_to_vmem [thread:$0]  %s5379_s4, 16, %s58_s21, [#allocation8]  }
  0x48   :  { %s4608_s20 = scalar_lea.hbm %s5383_s8, 512 }
  0x49   :  { %p4609_p4 = scmp.ne.s32.totalorder %s5383_s8, %s4608_s20  ;;  %p4612_p5 = scmp.lt.u32.totalorder %s4608_s20, %s5383_s8 }
  0x4b   :  { %p4614_p6 = pnand %p4612_p5, %p4609_p4 }
  0x4d   :  { %4617 = shalt.err (!%p4614_p6)
}
  0x4e   :  { %s4618_s28 = scalar_lea.vmem %s83_s23, 512  ;;  %p4623_p8 = scmp.lt.s32.totalorder %s83_s23, %s83_s23 }
  0x4f   :  { %p4619_p7 = scmp.ne.s32.totalorder %s83_s23, %s4618_s28  ;;  %p4624_p9 = scmp.lt.s32.totalorder %s4618_s28, %s4618_s28 }
  0x51   :  { %p4625_p10 = por %p4624_p9, %p4623_p8 }
  0x53   :  { %p4626_p11 = pnand %p4625_p10, %p4619_p7 }
  0x55   :  { %4629 = shalt.err (!%p4626_p11)
}
  0x56   :  { %88 = dma.hbm_to_vmem [thread:$0]  %s5383_s8, 512, %s83_s23, [#allocation11], %s4709_s30, %s4709_s30, %s4710_s22  }
  0x57   :  { %4696 = dma.done.wait [#allocation5], 256  }
  0x58   :  { %4697 = vsyncadd [#allocation5], 4294967040 }
  0x59   :  { %4698 = dma.done.wait [#allocation8], 32  }
  0x5a   :  { %4699 = vsyncadd [#allocation8], 4294967264 }
  0x5b   :  { %4700 = dma.done.wait [#allocation11], 768  }
  0x5c   :  { %4701 = vsyncadd [#allocation11], 4294966528  ;;  %v4713_v0 = vmov 0.0|0.0   ;;  %vm4714_vm0 = vmmov 0   ;;  %v4715_v1 = vmov 0.0   ;;  %v119_v2 = vld [vmem:[%s5376_s1] sm:$0xff] }
  0x5d   :  { %4234 = vmatprep.subr.bf16.mxu0 %v4713_v0  ;;  %3834 = vmatprep.mubr.msk.f32.mxu0 %vm4714_vm0, %v4715_v1  ;;  %v120_v3 = vld [vmem:[%s5376_s1 + $0x8] sm:$0xff]  ;;  %v121_v4 = vld [vmem:[%s5376_s1 + $0x10] sm:$0xff]  ;;  %v122_v6 = vld [vmem:[%s5376_s1 + $0x18] sm:$0xff]  ;;  %vm154_vm1 = vcmask 1041409   ;;  %vm156_vm2 = vcmask 261120   ;;  %vm115_vm3 = vcmask 254976  }
  0x5e   :  { %4240 = vmatprep.subr.bf16.mxu1 %v4713_v0  ;;  %3845 = vmatprep.mubr.msk.f32.mxu1 %vm4714_vm0, %v4715_v1  ;;  %v4882_v5 = vpack.c.bf16 %v120_v3, %v119_v2  ;;  %v4887_v7 = vld [vmem:[#allocation4 + $0x8] sm:$0xff]  ;;  %v124_v8 = vld [vmem:[%s5378_s3] sm:$0xff]  ;;  %v4896_v10 = vpack.c.bf16 %v122_v6, %v121_v4  ;;  %v127_v16 = vld [vmem:[%s5378_s3 + $0x18] sm:$0xff]  ;;  %vm383_vm4 = vcmask 130048   ;;  %s4716_s18 = smov 64   ;;  %s4717_s19 = smov 32  }
  0x5f   :  { %v125_v9 = vld [vmem:[%s5378_s3 + $0x8] sm:$0xff]  ;;  %v153_v11 = vrot.slane %v4887_v7, 7  ;;  %v126_v15 = vld [vmem:[%s5378_s3 + $0x10] sm:$0xff]  ;;  %v136_v18 = vld [vmem:[%s5381_s6] sm:$0xff]  ;;  %s4720_s20 = smov [#allocation14]  }
  0x60   :  { %4236 = vmatpush3.bf16.msra.mxu0 %v4882_v5  ;;  %v4899_v12 = vpack.c.bf16 %v125_v9, %v124_v8  ;;  %v4902_v13 = vld [vmem:[#allocation4] sm:$0xff]  ;;  %v4919_v17 = vpack.c.bf16 %v127_v16, %v126_v15  ;;  %v4933_v21 = vld [vmem:[#allocation7] ss:$0 sm:$0xff]  ;;  %v114_v26 = vld [vmem:[%s5385_s10] sm:$0x3]  ;;  %s3554_s1 = sshll.u32 %s4720_s20, 4  ;;  %s3555_s1 = int_to_ptr.vmem [resolvable:$true] %s3554_s1 }
  0x61   :  { %4237 = vmatprep.subr.bf16.mxu0 %v4713_v0  ;;  %v155_v14 = vsel %vm154_vm1, %v153_v11, %v4902_v13  ;;  %v137_v19 = vld [vmem:[%s5381_s6 + $0x8] sm:$0xff]  ;;  %116 = vst.msk [vmem:[#allocation2] sm:$0x3] %vm115_vm3, %v114_v26  ;;  %v138_v27 = vld [vmem:[%s5381_s6 + $0x10] sm:$0xff]  ;;  %v139_v28 = vld [vmem:[%s5381_s6 + $0x18] sm:$0xff]  ;;  %v598_v55 = vrot.slane %v4902_v13, 1  ;;  %p4635_p13 = scmp.lt.s32.totalorder %s3555_s1, %s3555_s1 }
  0x62   :  { %4242 = vmatpush3.bf16.msra.mxu1 %v4899_v12  ;;  %v4929_v20 = vpack.c.bf16 %v137_v19, %v136_v18  ;;  %v4949_v29 = vpack.c.bf16 %v139_v28, %v138_v27  ;;  %v134_v30 = vld [vmem:[#allocation10] sm:$0xff]  ;;  %v135_v31 = vld [vmem:[#allocation10 + $0x8] sm:$0xff]  ;;  %v4964_v34 = vld [vmem:[#allocation9] ss:$0 sm:$0xff]  ;;  %v4718_v19 = vmov 1966171168  }
  0x63   :  { %4243 = vmatprep.subr.bf16.mxu1 %v4713_v0  ;;  %v4951_v32 = vpack.c.bf16 %v135_v31, %v134_v30  ;;  %v117_v41 = vld [vmem:[%s5386_s11] sm:$0x3]  ;;  %v599_v56 = vsel %vm154_vm1, %v4887_v7, %v598_v55  ;;  %v129_v61 = vld [vmem:[#allocation12] sm:$0xff]  ;;  %v130_v62 = vld [vmem:[#allocation12 + $0x8] sm:$0xff]  ;;  %v1016_v55 = vrot.slane %v4887_v7, 1  ;;  %s4630_s2 = scalar_lea.vmem %s3555_s1, 32 }
  0x64   :  { %4239 = vmatpush3.bf16.msra.mxu0 %v4896_v10  ;;  %118 = vst.msk [vmem:[#allocation3] sm:$0x3] %vm115_vm3, %v117_v41  ;;  %v4977_v42 = vld [vmem:[%s5382_s7] ss:$0 sm:$0xff]  ;;  %v131_v63 = vld [vmem:[#allocation12 + $0x10] sm:$0xff]  ;;  %v4996_v2 = vpack.c.bf16 %v130_v62, %v129_v61  ;;  %p4631_p12 = scmp.ne.s32.totalorder %s3555_s1, %s4630_s2  ;;  %p4636_p0 = scmp.lt.s32.totalorder %s4630_s2, %s4630_s2 }
  0x65   :  { %4246 = vmatprep.subr.bf16.mxu0 %v4713_v0  ;;  %v132_v3 = vld [vmem:[#allocation12 + $0x18] sm:$0xff] }
  0x66   :  { %4245 = vmatpush3.bf16.msra.mxu1 %v4919_v17  ;;  %v4999_v4 = vpack.c.bf16 %v132_v3, %v131_v63  ;;  %v5029_v26 = vld [vmem:[%s5384_s9] ss:$0 sm:$0xff]  ;;  %p4637_p1 = por %p4636_p0, %p4635_p13 }
  0x67   :  { %3835 = vmatmul.mubr.msk.f32.vlgmr.msra.gmra.mrb[0].mxu0 %vm156_vm2, %v155_v14  ;;  %4252 = vmatprep.subr.bf16.mxu1 %v4713_v0 }
  0x68   :  { %3856 = vmatprep.mubr.msk.f32.mxu0 %vm4714_vm0, %v4715_v1  ;;  %4248 = vmatpush3.bf16.msra.mxu0 %v4929_v20  ;;  %v141_v33 = vld [vmem:[#allocation2] sm:$0x3]  ;;  %p4638_p2 = pnand %p4637_p1, %p4631_p12 }
  0x69   :  { %4249 = vmatprep.subr.bf16.mxu0 %v4713_v0 }
  0x6b   :  { %v142_v48 = vld [vmem:[#allocation3] sm:$0x3] }
  0x6c   :  { %4251 = vmatpush3.bf16.msra.mxu0 %v4949_v29 }
  0x6d   :  { %4261 = vmatprep.subr.bf16.mxu0 %v4713_v0 }
  0x6f   :  { %3857 = vmatmul.mubr.msk.f32.vlgmr.msra.gmra.mrb[2].mxu0 %vm156_vm2, %v141_v33 }
  0x70   :  { %4263 = vmatpush3.bf16.msra.mxu0 %v4882_v5  ;;  %3885 = vmatprep.mubr.msk.f32.mxu0 %vm4714_vm0, %v4715_v1 }
  0x71   :  { %4264 = vmatprep.subr.bf16.mxu0 %v4713_v0 }
  0x74   :  { %4266 = vmatpush3.bf16.msra.mxu0 %v4896_v10 }
  0x75   :  { %4273 = vmatprep.subr.bf16.mxu0 %v4713_v0 }
  0x77   :  { %3886 = vmatmul.mubr.msk.f32.vlgmr.msra.gmra.mrb[4].mxu0 %vm156_vm2, %v599_v56 }
  0x78   :  { %4275 = vmatpush3.bf16.msra.mxu0 %v4929_v20  ;;  %3907 = vmatprep.mubr.msk.f32.mxu0 %vm4714_vm0, %v4715_v1 }
  0x79   :  { %4276 = vmatprep.subr.bf16.mxu0 %v4713_v0 }
  0x7c   :  { %4278 = vmatpush3.bf16.msra.mxu0 %v4949_v29 }
  0x7d   :  { %4282 = vmatprep.subr.bf16.mxu0 %v4713_v0 }
 0x13a   :  { %v225_v22 = vpop.f32.mrb[0].mxu0 }
 0x13b   :  { %v226_v23 = vadd.f32 %v4933_v21, %v225_v22  ;;  %v3836_v24 = vpop.f32.mrb[1].mxu0  ;;  %v573_v22 = vunpack.c.l.s4 %v4718_v19 }
 0x13d   :  { %v229_v25 = vmax.f32 %v226_v23, 0.0  ;;  %v575_v23 = vlaneseq  ;;  %v574_v24 = vunpack.c.0.s8 %v573_v22 }
 0x13f   :  { %3846 = vmatmul.mubr.msk.f32.vlgmr.msra.gmra.mrb[0].mxu1 %vm156_vm2, %v229_v25  ;;  %v576_v25 = vshrl.u32 %v575_v23, 7 }
 0x140   :  { %3863 = vmatprep.mubr.msk.f32.mxu1 %vm4714_vm0, %v4715_v1  ;;  %4254 = vmatpush3.bf16.msra.mxu1 %v4951_v32 }
 0x141   :  { %4255 = vmatprep.subr.bf16.mxu1 %v4713_v0  ;;  %v5031_v27 = vsub.s32 %v574_v24, %v576_v25 }
 0x142   :  { %v379_v39 = vpop.f32.mrb[2].mxu0 }
 0x143   :  { %v3858_v40 = vpop.f32.mrb[3].mxu0 }
 0x14a   :  { %v668_v8 = vpop.f32.mrb[4].mxu0 }
 0x14b   :  { %v3887_v9 = vpop.f32.mrb[5].mxu0  ;;  %v669_v16 = vadd.f32 %v4933_v21, %v668_v8 }
 0x14d   :  { %v672_v18 = vmax.f32 %v669_v16, 0.0 }
 0x212   :  { %v305_v35 = vpop.f32.mrb[0].mxu1 }
 0x213   :  { %v306_v36 = vadd.f32 %v4964_v34, %v305_v35  ;;  %v3847_v37 = vpop.f32.mrb[1].mxu1 }
 0x215   :  { %v309_v38 = vmax.f32 %v306_v36, 0.0 }
 0x217   :  { %3864 = vmatmul.mubr.msk.f32.vlgmr.msra.gmra.mrb[2].mxu1 %vm383_vm4, %v309_v38 }
 0x218   :  { %3874 = vmatprep.mubr.msk.f32.mxu1 %vm4714_vm0, %v4715_v1  ;;  %4257 = vmatpush3.bf16.msra.mxu1 %v4996_v2 }
 0x219   :  { %4258 = vmatprep.subr.bf16.mxu1 %v4713_v0 }
 0x21c   :  { %4260 = vmatpush3.bf16.msra.mxu1 %v4999_v4 }
 0x21d   :  { %4267 = vmatprep.subr.bf16.mxu1 %v4713_v0 }
 0x2ea   :  { %v453_v43 = vpop.f32.mrb[2].mxu1 }
 0x2eb   :  { %v454_v44 = vadd.f32 %v453_v43, %v379_v39  ;;  %v3865_v45 = vpop.f32.mrb[3].mxu1 }
 0x2ed   :  { %v463_v46 = vadd.f32 %v4977_v42, %v454_v44 }
 0x2ef   :  { %4467 = vtanh.f32 %v463_v46  ;;  %v464_v49 = vmul.f32 0.5, %v463_v46 }
 0x2f1   :  { %4469 = vtanh.f32 %v464_v49 }
 0x2f9   :  { %v4468_v47 = vpop.eup %4467 }
 0x2fa   :  { %475 = vrot.lane.b32.xlu0 %v4468_v47, %s4716_s18 }
 0x2fb   :  { %v4470_v50 = vpop.eup %4469 }
 0x2fc   :  { %v466_v51 = vmul.f32 0.5, %v4470_v50 }
 0x2fe   :  { %470 = vrot.lane.b32.xlu0 %v142_v48, %s4717_s19  ;;  %v467_v52 = vadd.f32 0.5, %v466_v51 }
 0x36c   :  { %v476_v53 = vpop.permute.xlu0 %475 }
 0x36d   :  { %v478_v54 = vmul.f32 %v476_v53, %v467_v52 }
 0x36f   :  { %480 = vrot.lane.b32.xlu1 %v478_v54, %s4717_s19  ;;  %v1015_v54 = vrot.slane %v4902_v13, 2 }
 0x370   :  { %v471_v57 = vpop.permute.xlu0 %470 }
 0x371   :  { %v473_v58 = vmul.f32 %v471_v57, %v467_v52  ;;  %v1017_v56 = vsel %vm154_vm1, %v1016_v55, %v1015_v54 }
 0x3e1   :  { %v481_v59 = vpop.permute.xlu1 %480 }
 0x3e2   :  { %v4993_v60 = vadd.f32 %v481_v59, %v473_v58 }
 0x3e4   :  { %4471 = vtanh.f32 %v4993_v60 }
 0x3ee   :  { %v4472_v6 = vpop.eup %4471 }
 0x3ef   :  { %486 = vrot.lane.b32.xlu1 %v4472_v6, %s4716_s18 }
 0x461   :  { %v487_v11 = vpop.permute.xlu1 %486 }
 0x462   :  { %v489_v14 = vmul.f32 %v487_v11, %v467_v52 }
 0x464   :  { %497 = vrot.lane.b32.xlu0 %v489_v14, %s4717_s19 }
 0x4d6   :  { %v498_v15 = vpop.permute.xlu0 %497 }
 0x4d7   :  { %3875 = vmatmul.mubr.msk.f32.vlgmr.msra.gmra.mrb[4].mxu1 %vm156_vm2, %v498_v15  ;;  %3908 = vmatmul.mubr.msk.f32.vlgmr.msra.gmra.mrb[6].mxu0 %vm156_vm2, %v498_v15 }
 0x4d8   :  { %4269 = vmatpush3.bf16.msra.mxu1 %v4899_v12  ;;  %3896 = vmatprep.mubr.msk.f32.mxu1 %vm4714_vm0, %v4715_v1 }
 0x4d9   :  { %4270 = vmatprep.subr.bf16.mxu1 %v4713_v0  ;;  %4284 = vmatpush3.bf16.msra.mxu0 %v4996_v2 }
 0x4da   :  { %4285 = vmatprep.subr.bf16.mxu0 %v4713_v0  ;;  %3925 = vmatprep.mubr.msk.f32.mxu0 %vm4714_vm0, %v4715_v1 }
 0x4dc   :  { %4272 = vmatpush3.bf16.msra.mxu1 %v4919_v17 }
 0x4dd   :  { %4279 = vmatprep.subr.bf16.mxu1 %v4713_v0  ;;  %4287 = vmatpush3.bf16.msra.mxu0 %v4999_v4 }
 0x4de   :  { %4294 = vmatprep.subr.bf16.mxu0 %v4713_v0 }
 0x4df   :  { %3897 = vmatmul.mubr.msk.f32.vlgmr.msra.gmra.mrb[6].mxu1 %vm156_vm2, %v672_v18 }
 0x4e0   :  { %4281 = vmatpush3.bf16.msra.mxu1 %v4951_v32  ;;  %3914 = vmatprep.mubr.msk.f32.mxu1 %vm4714_vm0, %v4715_v1 }
 0x4e1   :  { %4288 = vmatprep.subr.bf16.mxu1 %v4713_v0 }
 0x5aa   :  { %v567_v28 = vpop.f32.mrb[4].mxu1  ;;  %v813_v30 = vpop.f32.mrb[6].mxu0 }
 0x5ab   :  { %v568_v31 = vadd.f32 %v5029_v26, %v567_v28  ;;  %v3876_v33 = vpop.f32.mrb[5].mxu1  ;;  %v3909_v35 = vpop.f32.mrb[7].mxu0 }
 0x5ad   :  { %v578_v36 = vrot.slane %v568_v31, %v5031_v27 }
 0x5af   :  { %v579_v37 = vcombine.high %v578_v36, %v578_v36  ;;  %3591 = vst.sshfl [vmem:[#allocation13] sm:$0x1 pattern:$0x73625140] %v578_v36 }
 0x5b1   :  { %3592 = vst.sshfl [vmem:[#allocation13 + $0x8] sm:$0x1 pattern:$0x73625140] %v579_v37 }
 0x5b2   :  { %v742_v38 = vpop.f32.mrb[6].mxu1 }
 0x5b3   :  { %v743_v39 = vadd.f32 %v4964_v34, %v742_v38  ;;  %v3898_v40 = vpop.f32.mrb[7].mxu1 }
 0x5b5   :  { %v746_v41 = vmax.f32 %v743_v39, 0.0 }
 0x5b7   :  { %3915 = vmatmul.mubr.msk.f32.vlgmr.msra.gmra.mrb[8].mxu1 %vm383_vm4, %v746_v41 }
 0x5b8   :  { %4290 = vmatpush3.bf16.msra.mxu1 %v4882_v5  ;;  %3936 = vmatprep.mubr.msk.f32.mxu1 %vm4714_vm0, %v4715_v1 }
 0x5b9   :  { %4291 = vmatprep.subr.bf16.mxu1 %v4713_v0 }
 0x5bc   :  { %4293 = vmatpush3.bf16.msra.mxu1 %v4896_v10 }
 0x5bd   :  { %4300 = vmatprep.subr.bf16.mxu1 %v4713_v0 }
 0x5bf   :  { %3937 = vmatmul.mubr.msk.f32.vlgmr.msra.gmra.mrb[10].mxu1 %vm156_vm2, %v1017_v56 }
 0x5c0   :  { %4302 = vmatpush3.bf16.msra.mxu1 %v4929_v20  ;;  %3958 = vmatprep.mubr.msk.f32.mxu1 %vm4714_vm0, %v4715_v1 }
 0x5c1   :  { %4303 = vmatprep.subr.bf16.mxu1 %v4713_v0 }
 0x5c4   :  { %4305 = vmatpush3.bf16.msra.mxu1 %v4949_v29 }
 0x5c5   :  { %4306 = vmatprep.subr.bf16.mxu1 %v4713_v0 }
 0x68a   :  { %v886_v43 = vpop.f32.mrb[8].mxu1 }
 0x68b   :  { %v887_v44 = vadd.f32 %v886_v43, %v813_v30  ;;  %v3916_v45 = vpop.f32.mrb[9].mxu1 }
 0x68c   :  { %v1434_v45 = vrot.slane %v4887_v7, 2 }
 0x68d   :  { %v890_v46 = vadd.f32 %v4977_v42, %v887_v44  ;;  %v1433_v44 = vrot.slane %v4902_v13, 3 }
 0x68f   :  { %4473 = vtanh.f32 %v890_v46  ;;  %v891_v48 = vmul.f32 0.5, %v890_v46  ;;  %v1435_v46 = vsel %vm154_vm1, %v1434_v45, %v1433_v44 }
 0x691   :  { %4475 = vtanh.f32 %v891_v48 }
 0x692   :  { %v1086_v62 = vpop.f32.mrb[10].mxu1 }
 0x693   :  { %v3938_v63 = vpop.f32.mrb[11].mxu1 }
 0x699   :  { %v4474_v47 = vpop.eup %4473 }
 0x69a   :  { %898 = vrot.lane.b32.xlu1 %v4474_v47, %s4716_s18 }
 0x69b   :  { %v4476_v49 = vpop.eup %4475 }
 0x69c   :  { %v893_v50 = vmul.f32 0.5, %v4476_v49 }
 0x69e   :  { %v894_v51 = vadd.f32 0.5, %v893_v50 }
 0x6a0   :  { %v896_v57 = vmul.f32 %v894_v51, %v4993_v60  ;;  %v1087_v60 = vadd.f32 %v4933_v21, %v1086_v62 }
 0x6a2   :  { %v1090_v9 = vmax.f32 %v1087_v60, 0.0 }
 0x70c   :  { %v899_v52 = vpop.permute.xlu1 %898 }
 0x70d   :  { %v901_v53 = vmul.f32 %v899_v52, %v894_v51 }
 0x70f   :  { %903 = vrot.lane.b32.xlu0 %v901_v53, %s4717_s19 }
 0x781   :  { %v904_v58 = vpop.permute.xlu0 %903 }
 0x782   :  { %v5057_v59 = vadd.f32 %v904_v58, %v896_v57 }
 0x784   :  { %4477 = vtanh.f32 %v5057_v59 }
 0x78e   :  { %v4478_v61 = vpop.eup %4477 }
 0x78f   :  { %909 = vrot.lane.b32.xlu1 %v4478_v61, %s4716_s18 }
 0x801   :  { %v910_v3 = vpop.permute.xlu1 %909 }
 0x802   :  { %v912_v6 = vmul.f32 %v910_v3, %v894_v51 }
 0x804   :  { %914 = vrot.lane.b32.xlu0 %v912_v6, %s4717_s19 }
 0x876   :  { %v915_v8 = vpop.permute.xlu0 %914 }
 0x877   :  { %3926 = vmatmul.mubr.msk.f32.vlgmr.msra.gmra.mrb[8].mxu0 %vm156_vm2, %v915_v8  ;;  %3959 = vmatmul.mubr.msk.f32.vlgmr.msra.gmra.mrb[12].mxu1 %vm156_vm2, %v915_v8 }
 0x878   :  { %4296 = vmatpush3.bf16.msra.mxu0 %v4899_v12  ;;  %3947 = vmatprep.mubr.msk.f32.mxu0 %vm4714_vm0, %v4715_v1 }
 0x879   :  { %4297 = vmatprep.subr.bf16.mxu0 %v4713_v0  ;;  %4308 = vmatpush3.bf16.msra.mxu1 %v4951_v32 }
 0x87a   :  { %3965 = vmatprep.mubr.msk.f32.mxu1 %vm4714_vm0, %v4715_v1  ;;  %4309 = vmatprep.subr.bf16.mxu1 %v4713_v0 }
 0x87c   :  { %4299 = vmatpush3.bf16.msra.mxu0 %v4919_v17 }
 0x87d   :  { %4315 = vmatprep.subr.bf16.mxu0 %v4713_v0 }
 0x87f   :  { %3948 = vmatmul.mubr.msk.f32.vlgmr.msra.gmra.mrb[10].mxu0 %vm156_vm2, %v1090_v9 }
 0x880   :  { %4317 = vmatpush3.bf16.msra.mxu0 %v4882_v5  ;;  %3987 = vmatprep.mubr.msk.f32.mxu0 %vm4714_vm0, %v4715_v1 }
 0x881   :  { %4318 = vmatprep.subr.bf16.mxu0 %v4713_v0 }
 0x884   :  { %4320 = vmatpush3.bf16.msra.mxu0 %v4896_v10 }
 0x885   :  { %4327 = vmatprep.subr.bf16.mxu0 %v4713_v0 }
 0x887   :  { %3988 = vmatmul.mubr.msk.f32.vlgmr.msra.gmra.mrb[12].mxu0 %vm156_vm2, %v1435_v46 }
 0x888   :  { %4329 = vmatpush3.bf16.msra.mxu0 %v4929_v20  ;;  %4009 = vmatprep.mubr.msk.f32.mxu0 %vm4714_vm0, %v4715_v1 }
 0x889   :  { %4330 = vmatprep.subr.bf16.mxu0 %v4713_v0 }
 0x88c   :  { %4332 = vmatpush3.bf16.msra.mxu0 %v4949_v29 }
 0x88d   :  { %4336 = vmatprep.subr.bf16.mxu0 %v4713_v0 }
 0x94a   :  { %v984_v11 = vpop.f32.mrb[8].mxu0  ;;  %v1231_v14 = vpop.f32.mrb[12].mxu1 }
 0x94b   :  { %v985_v15 = vadd.f32 %v5029_v26, %v984_v11  ;;  %v3927_v16 = vpop.f32.mrb[9].mxu0  ;;  %v3960_v18 = vpop.f32.mrb[13].mxu1 }
 0x94d   :  { %v995_v19 = vrot.slane %v985_v15, %v5031_v27 }
 0x94f   :  { %v996_v22 = vcombine.high %v995_v19, %v995_v19  ;;  %3598 = vst.sshfl [vmem:[#allocation13 + $0x1] sm:$0x1 pattern:$0x73625140] %v995_v19 }
 0x951   :  { %3599 = vst.sshfl [vmem:[#allocation13 + $0x9] sm:$0x1 pattern:$0x73625140] %v996_v22 }
 0x952   :  { %v1160_v23 = vpop.f32.mrb[10].mxu0 }
 0x953   :  { %v1161_v24 = vadd.f32 %v4964_v34, %v1160_v23  ;;  %v3949_v25 = vpop.f32.mrb[11].mxu0 }
 0x955   :  { %v1164_v28 = vmax.f32 %v1161_v24, 0.0 }
 0x957   :  { %3966 = vmatmul.mubr.msk.f32.vlgmr.msra.gmra.mrb[14].mxu1 %vm383_vm4, %v1164_v28 }
 0x958   :  { %4311 = vmatpush3.bf16.msra.mxu1 %v4996_v2  ;;  %3976 = vmatprep.mubr.msk.f32.mxu1 %vm4714_vm0, %v4715_v1 }
 0x959   :  { %4312 = vmatprep.subr.bf16.mxu1 %v4713_v0 }
 0x95a   :  { %v1504_v51 = vpop.f32.mrb[12].mxu0 }
 0x95b   :  { %v3989_v52 = vpop.f32.mrb[13].mxu0  ;;  %v1505_v56 = vadd.f32 %v4933_v21, %v1504_v51 }
 0x95c   :  { %4314 = vmatpush3.bf16.msra.mxu1 %v4999_v4 }
 0x95d   :  { %4321 = vmatprep.subr.bf16.mxu1 %v4713_v0  ;;  %v1508_v57 = vmax.f32 %v1505_v56, 0.0 }
 0xa2a   :  { %v1304_v30 = vpop.f32.mrb[14].mxu1 }
 0xa2b   :  { %v1305_v31 = vadd.f32 %v1304_v30, %v1231_v14  ;;  %v3967_v33 = vpop.f32.mrb[15].mxu1 }
 0xa2c   :  { %v1852_v33 = vrot.slane %v4887_v7, 3 }
 0xa2d   :  { %v1308_v35 = vadd.f32 %v4977_v42, %v1305_v31  ;;  %v1851_v31 = vrot.slane %v4902_v13, 4 }
 0xa2f   :  { %4479 = vtanh.f32 %v1308_v35  ;;  %v1309_v37 = vmul.f32 0.5, %v1308_v35  ;;  %v1853_v35 = vsel %vm154_vm1, %v1852_v33, %v1851_v31 }
 0xa31   :  { %4481 = vtanh.f32 %v1309_v37 }
 0xa39   :  { %v4480_v36 = vpop.eup %4479 }
 0xa3a   :  { %1316 = vrot.lane.b32.xlu1 %v4480_v36, %s4716_s18 }
 0xa3b   :  { %v4482_v38 = vpop.eup %4481 }
 0xa3c   :  { %v1311_v39 = vmul.f32 0.5, %v4482_v38 }
 0xa3e   :  { %v1312_v40 = vadd.f32 0.5, %v1311_v39 }
 0xa40   :  { %v1314_v47 = vmul.f32 %v1312_v40, %v5057_v59 }
 0xaac   :  { %v1317_v41 = vpop.permute.xlu1 %1316 }
 0xaad   :  { %v1319_v43 = vmul.f32 %v1317_v41, %v1312_v40 }
 0xaaf   :  { %1321 = vrot.lane.b32.xlu0 %v1319_v43, %s4717_s19 }
 0xb21   :  { %v1322_v48 = vpop.permute.xlu0 %1321 }
 0xb22   :  { %v5106_v49 = vadd.f32 %v1322_v48, %v1314_v47 }
 0xb24   :  { %4483 = vtanh.f32 %v5106_v49 }
 0xb2e   :  { %v4484_v50 = vpop.eup %4483 }
 0xb2f   :  { %1327 = vrot.lane.b32.xlu1 %v4484_v50, %s4716_s18 }
 0xba1   :  { %v1328_v53 = vpop.permute.xlu1 %1327 }
 0xba2   :  { %v1330_v54 = vmul.f32 %v1328_v53, %v1312_v40 }
 0xba4   :  { %1332 = vrot.lane.b32.xlu0 %v1330_v54, %s4717_s19 }
 0xc16   :  { %v1333_v55 = vpop.permute.xlu0 %1332 }
 0xc17   :  { %3977 = vmatmul.mubr.msk.f32.vlgmr.msra.gmra.mrb[16].mxu1 %vm156_vm2, %v1333_v55  ;;  %4010 = vmatmul.mubr.msk.f32.vlgmr.msra.gmra.mrb[14].mxu0 %vm156_vm2, %v1333_v55 }
 0xc18   :  { %4323 = vmatpush3.bf16.msra.mxu1 %v4899_v12  ;;  %3998 = vmatprep.mubr.msk.f32.mxu1 %vm4714_vm0, %v4715_v1 }
 0xc19   :  { %4324 = vmatprep.subr.bf16.mxu1 %v4713_v0  ;;  %4338 = vmatpush3.bf16.msra.mxu0 %v4996_v2 }
 0xc1a   :  { %4339 = vmatprep.subr.bf16.mxu0 %v4713_v0  ;;  %4027 = vmatprep.mubr.msk.f32.mxu0 %vm4714_vm0, %v4715_v1 }
 0xc1c   :  { %4326 = vmatpush3.bf16.msra.mxu1 %v4919_v17 }
 0xc1d   :  { %4333 = vmatprep.subr.bf16.mxu1 %v4713_v0  ;;  %4341 = vmatpush3.bf16.msra.mxu0 %v4999_v4 }
 0xc1e   :  { %4348 = vmatprep.subr.bf16.mxu0 %v4713_v0 }
 0xc1f   :  { %3999 = vmatmul.mubr.msk.f32.vlgmr.msra.gmra.mrb[18].mxu1 %vm156_vm2, %v1508_v57 }
 0xc20   :  { %4335 = vmatpush3.bf16.msra.mxu1 %v4951_v32  ;;  %4016 = vmatprep.mubr.msk.f32.mxu1 %vm4714_vm0, %v4715_v1 }
 0xc21   :  { %4342 = vmatprep.subr.bf16.mxu1 %v4713_v0 }
 0xcea   :  { %v1402_v58 = vpop.f32.mrb[16].mxu1  ;;  %v1649_v59 = vpop.f32.mrb[14].mxu0 }
 0xceb   :  { %v1403_v61 = vadd.f32 %v5029_v26, %v1402_v58  ;;  %v3978_v62 = vpop.f32.mrb[17].mxu1  ;;  %v4011_v63 = vpop.f32.mrb[15].mxu0 }
 0xced   :  { %v1413_v3 = vrot.slane %v1403_v61, %v5031_v27 }
 0xcef   :  { %v1414_v6 = vcombine.high %v1413_v3, %v1413_v3  ;;  %3605 = vst.sshfl [vmem:[#allocation13 + $0x2] sm:$0x1 pattern:$0x73625140] %v1413_v3 }
 0xcf1   :  { %3606 = vst.sshfl [vmem:[#allocation13 + $0xa] sm:$0x1 pattern:$0x73625140] %v1414_v6 }
 0xcf2   :  { %v1578_v8 = vpop.f32.mrb[18].mxu1 }
 0xcf3   :  { %v1579_v60 = vadd.f32 %v4964_v34, %v1578_v8  ;;  %v4000_v9 = vpop.f32.mrb[19].mxu1 }
 0xcf5   :  { %v1582_v11 = vmax.f32 %v1579_v60, 0.0 }
 0xcf7   :  { %4017 = vmatmul.mubr.msk.f32.vlgmr.msra.gmra.mrb[20].mxu1 %vm383_vm4, %v1582_v11 }
 0xcf8   :  { %4344 = vmatpush3.bf16.msra.mxu1 %v4882_v5  ;;  %4038 = vmatprep.mubr.msk.f32.mxu1 %vm4714_vm0, %v4715_v1 }
 0xcf9   :  { %4345 = vmatprep.subr.bf16.mxu1 %v4713_v0 }
 0xcfc   :  { %4347 = vmatpush3.bf16.msra.mxu1 %v4896_v10 }
 0xcfd   :  { %4354 = vmatprep.subr.bf16.mxu1 %v4713_v0 }
 0xcff   :  { %4039 = vmatmul.mubr.msk.f32.vlgmr.msra.gmra.mrb[22].mxu1 %vm156_vm2, %v1853_v35 }
 0xd00   :  { %4356 = vmatpush3.bf16.msra.mxu1 %v4929_v20  ;;  %4060 = vmatprep.mubr.msk.f32.mxu1 %vm4714_vm0, %v4715_v1 }
 0xd01   :  { %4357 = vmatprep.subr.bf16.mxu1 %v4713_v0 }
 0xd04   :  { %4359 = vmatpush3.bf16.msra.mxu1 %v4949_v29 }
 0xd05   :  { %4363 = vmatprep.subr.bf16.mxu1 %v4713_v0 }
 0xdca   :  { %v1722_v14 = vpop.f32.mrb[20].mxu1 }
 0xdcb   :  { %v1723_v15 = vadd.f32 %v1722_v14, %v1649_v59  ;;  %v4018_v16 = vpop.f32.mrb[21].mxu1 }
 0xdcc   :  { %v2270_v16 = vrot.slane %v4887_v7, 4 }
 0xdcd   :  { %v1726_v18 = vadd.f32 %v4977_v42, %v1723_v15  ;;  %v2269_v15 = vrot.slane %v4902_v13, 5 }
 0xdcf   :  { %4485 = vtanh.f32 %v1726_v18  ;;  %v1727_v22 = vmul.f32 0.5, %v1726_v18  ;;  %v2271_v18 = vsel %vm154_vm1, %v2270_v16, %v2269_v15 }
 0xdd1   :  { %4487 = vtanh.f32 %v1727_v22 }
 0xdd2   :  { %v1922_v40 = vpop.f32.mrb[22].mxu1 }
 0xdd3   :  { %v4040_v41 = vpop.f32.mrb[23].mxu1  ;;  %v1923_v46 = vadd.f32 %v4933_v21, %v1922_v40 }
 0xdd5   :  { %v1926_v47 = vmax.f32 %v1923_v46, 0.0 }
 0xdd9   :  { %v4486_v19 = vpop.eup %4485 }
 0xdda   :  { %1734 = vrot.lane.b32.xlu1 %v4486_v19, %s4716_s18 }
 0xddb   :  { %v4488_v23 = vpop.eup %4487 }
 0xddc   :  { %v1729_v24 = vmul.f32 0.5, %v4488_v23 }
 0xdde   :  { %v1730_v25 = vadd.f32 0.5, %v1729_v24 }
 0xde0   :  { %v1732_v36 = vmul.f32 %v1730_v25, %v5106_v49 }
 0xe4c   :  { %v1735_v28 = vpop.permute.xlu1 %1734 }
 0xe4d   :  { %v1737_v30 = vmul.f32 %v1735_v28, %v1730_v25 }
 0xe4f   :  { %1739 = vrot.lane.b32.xlu0 %v1737_v30, %s4717_s19 }
 0xec1   :  { %v1740_v37 = vpop.permute.xlu0 %1739 }
 0xec2   :  { %v5155_v38 = vadd.f32 %v1740_v37, %v1732_v36 }
 0xec4   :  { %4489 = vtanh.f32 %v5155_v38 }
 0xece   :  { %v4490_v39 = vpop.eup %4489 }
 0xecf   :  { %1745 = vrot.lane.b32.xlu1 %v4490_v39, %s4716_s18 }
 0xf41   :  { %v1746_v43 = vpop.permute.xlu1 %1745 }
 0xf42   :  { %v1748_v44 = vmul.f32 %v1746_v43, %v1730_v25 }
 0xf44   :  { %1750 = vrot.lane.b32.xlu0 %v1748_v44, %s4717_s19 }
 0xfb6   :  { %v1751_v45 = vpop.permute.xlu0 %1750 }
 0xfb7   :  { %4028 = vmatmul.mubr.msk.f32.vlgmr.msra.gmra.mrb[16].mxu0 %vm156_vm2, %v1751_v45  ;;  %4061 = vmatmul.mubr.msk.f32.vlgmr.msra.gmra.mrb[24].mxu1 %vm156_vm2, %v1751_v45 }
 0xfb8   :  { %4350 = vmatpush3.bf16.msra.mxu0 %v4899_v12  ;;  %4049 = vmatprep.mubr.msk.f32.mxu0 %vm4714_vm0, %v4715_v1 }
 0xfb9   :  { %4351 = vmatprep.subr.bf16.mxu0 %v4713_v0  ;;  %4365 = vmatpush3.bf16.msra.mxu1 %v4996_v2 }
 0xfba   :  { %4366 = vmatprep.subr.bf16.mxu1 %v4713_v0  ;;  %4078 = vmatprep.mubr.msk.f32.mxu1 %vm4714_vm0, %v4715_v1 }
 0xfbc   :  { %4353 = vmatpush3.bf16.msra.mxu0 %v4919_v17 }
 0xfbd   :  { %4360 = vmatprep.subr.bf16.mxu0 %v4713_v0  ;;  %4368 = vmatpush3.bf16.msra.mxu1 %v4999_v4 }
 0xfbe   :  { %4375 = vmatprep.subr.bf16.mxu1 %v4713_v0 }
 0xfbf   :  { %4050 = vmatmul.mubr.msk.f32.vlgmr.msra.gmra.mrb[18].mxu0 %vm156_vm2, %v1926_v47 }
 0xfc0   :  { %4362 = vmatpush3.bf16.msra.mxu0 %v4951_v32  ;;  %4067 = vmatprep.mubr.msk.f32.mxu0 %vm4714_vm0, %v4715_v1 }
 0xfc1   :  { %4369 = vmatprep.subr.bf16.mxu0 %v4713_v0 }
0x108a   :  { %v1820_v48 = vpop.f32.mrb[16].mxu0  ;;  %v2067_v49 = vpop.f32.mrb[24].mxu1 }
0x108b   :  { %v1821_v50 = vadd.f32 %v5029_v26, %v1820_v48  ;;  %v4029_v51 = vpop.f32.mrb[17].mxu0  ;;  %v4062_v52 = vpop.f32.mrb[25].mxu1 }
0x108d   :  { %v1831_v53 = vrot.slane %v1821_v50, %v5031_v27 }
0x108f   :  { %v1832_v54 = vcombine.high %v1831_v53, %v1831_v53  ;;  %3612 = vst.sshfl [vmem:[#allocation13 + $0x3] sm:$0x1 pattern:$0x73625140] %v1831_v53 }
0x1091   :  { %3613 = vst.sshfl [vmem:[#allocation13 + $0xb] sm:$0x1 pattern:$0x73625140] %v1832_v54 }
0x1092   :  { %v1996_v55 = vpop.f32.mrb[18].mxu0 }
0x1093   :  { %v1997_v56 = vadd.f32 %v4964_v34, %v1996_v55  ;;  %v4051_v57 = vpop.f32.mrb[19].mxu0 }
0x1095   :  { %v2000_v58 = vmax.f32 %v1997_v56, 0.0 }
0x1097   :  { %4068 = vmatmul.mubr.msk.f32.vlgmr.msra.gmra.mrb[20].mxu0 %vm383_vm4, %v2000_v58 }
0x1098   :  { %4371 = vmatpush3.bf16.msra.mxu0 %v4882_v5  ;;  %4089 = vmatprep.mubr.msk.f32.mxu0 %vm4714_vm0, %v4715_v1 }
0x1099   :  { %4372 = vmatprep.subr.bf16.mxu0 %v4713_v0 }
0x109c   :  { %4374 = vmatpush3.bf16.msra.mxu0 %v4896_v10 }
0x109d   :  { %4381 = vmatprep.subr.bf16.mxu0 %v4713_v0 }
0x109f   :  { %4090 = vmatmul.mubr.msk.f32.vlgmr.msra.gmra.mrb[22].mxu0 %vm156_vm2, %v2271_v18 }
0x10a0   :  { %4383 = vmatpush3.bf16.msra.mxu0 %v4929_v20  ;;  %4111 = vmatprep.mubr.msk.f32.mxu0 %vm4714_vm0, %v4715_v1 }
0x10a1   :  { %4384 = vmatprep.subr.bf16.mxu0 %v4713_v0 }
0x10a4   :  { %4386 = vmatpush3.bf16.msra.mxu0 %v4949_v29 }
0x10a5   :  { %4390 = vmatprep.subr.bf16.mxu0 %v4713_v0 }
0x116a   :  { %v2140_v59 = vpop.f32.mrb[20].mxu0 }
0x116b   :  { %v2141_v61 = vadd.f32 %v2140_v59, %v2067_v49  ;;  %v4069_v62 = vpop.f32.mrb[21].mxu0 }
0x116c   :  { %v2688_v62 = vrot.slane %v4887_v7, 5 }
0x116d   :  { %v2144_v63 = vadd.f32 %v4977_v42, %v2141_v61  ;;  %v2687_v61 = vrot.slane %v4902_v13, 6 }
0x116f   :  { %4491 = vtanh.f32 %v2144_v63  ;;  %v2145_v6 = vmul.f32 0.5, %v2144_v63  ;;  %v2689_v63 = vsel %vm154_vm1, %v2688_v62, %v2687_v61 }
0x1171   :  { %4493 = vtanh.f32 %v2145_v6 }
0x1172   :  { %v2340_v25 = vpop.f32.mrb[22].mxu0 }
0x1173   :  { %v4091_v28 = vpop.f32.mrb[23].mxu0  ;;  %v2341_v35 = vadd.f32 %v4933_v21, %v2340_v25 }
0x1175   :  { %v2344_v36 = vmax.f32 %v2341_v35, 0.0 }
0x1179   :  { %v4492_v3 = vpop.eup %4491 }
0x117a   :  { %2152 = vrot.lane.b32.xlu1 %v4492_v3, %s4716_s18 }
0x117b   :  { %v4494_v8 = vpop.eup %4493 }
0x117c   :  { %v2147_v60 = vmul.f32 0.5, %v4494_v8 }
0x117e   :  { %v2148_v9 = vadd.f32 0.5, %v2147_v60 }
0x1180   :  { %v2150_v19 = vmul.f32 %v2148_v9, %v5155_v38 }
0x11ec   :  { %v2153_v11 = vpop.permute.xlu1 %2152 }
0x11ed   :  { %v2155_v14 = vmul.f32 %v2153_v11, %v2148_v9 }
0x11ef   :  { %2157 = vrot.lane.b32.xlu0 %v2155_v14, %s4717_s19 }
0x1261   :  { %v2158_v22 = vpop.permute.xlu0 %2157 }
0x1262   :  { %v5204_v23 = vadd.f32 %v2158_v22, %v2150_v19 }
0x1264   :  { %4495 = vtanh.f32 %v5204_v23 }
0x126e   :  { %v4496_v24 = vpop.eup %4495 }
0x126f   :  { %2163 = vrot.lane.b32.xlu1 %v4496_v24, %s4716_s18 }
0x12e1   :  { %v2164_v30 = vpop.permute.xlu1 %2163 }
0x12e2   :  { %v2166_v31 = vmul.f32 %v2164_v30, %v2148_v9 }
0x12e4   :  { %2168 = vrot.lane.b32.xlu0 %v2166_v31, %s4717_s19 }
0x1356   :  { %v2169_v33 = vpop.permute.xlu0 %2168 }
0x1357   :  { %4079 = vmatmul.mubr.msk.f32.vlgmr.msra.gmra.mrb[26].mxu1 %vm156_vm2, %v2169_v33  ;;  %4112 = vmatmul.mubr.msk.f32.vlgmr.msra.gmra.mrb[24].mxu0 %vm156_vm2, %v2169_v33 }
0x1358   :  { %4377 = vmatpush3.bf16.msra.mxu1 %v4899_v12  ;;  %4100 = vmatprep.mubr.msk.f32.mxu1 %vm4714_vm0, %v4715_v1 }
0x1359   :  { %4378 = vmatprep.subr.bf16.mxu1 %v4713_v0  ;;  %4392 = vmatpush3.bf16.msra.mxu0 %v4996_v2 }
0x135a   :  { %4393 = vmatprep.subr.bf16.mxu0 %v4713_v0  ;;  %4129 = vmatprep.mubr.msk.f32.mxu0 %vm4714_vm0, %v4715_v1 }
0x135c   :  { %4380 = vmatpush3.bf16.msra.mxu1 %v4919_v17 }
0x135d   :  { %4387 = vmatprep.subr.bf16.mxu1 %v4713_v0  ;;  %4395 = vmatpush3.bf16.msra.mxu0 %v4999_v4 }
0x135e   :  { %4402 = vmatprep.subr.bf16.mxu0 %v4713_v0 }
0x135f   :  { %4101 = vmatmul.mubr.msk.f32.vlgmr.msra.gmra.mrb[28].mxu1 %vm156_vm2, %v2344_v36 }
0x1360   :  { %4389 = vmatpush3.bf16.msra.mxu1 %v4951_v32  ;;  %4118 = vmatprep.mubr.msk.f32.mxu1 %vm4714_vm0, %v4715_v1 }
0x1361   :  { %4396 = vmatprep.subr.bf16.mxu1 %v4713_v0 }
0x142a   :  { %v2238_v37 = vpop.f32.mrb[26].mxu1  ;;  %v2485_v38 = vpop.f32.mrb[24].mxu0 }
0x142b   :  { %v2239_v39 = vadd.f32 %v5029_v26, %v2238_v37  ;;  %v4080_v40 = vpop.f32.mrb[27].mxu1  ;;  %v4113_v41 = vpop.f32.mrb[25].mxu0 }
0x142d   :  { %v2249_v43 = vrot.slane %v2239_v39, %v5031_v27 }
0x142f   :  { %v2250_v44 = vcombine.high %v2249_v43, %v2249_v43  ;;  %3619 = vst.sshfl [vmem:[#allocation13 + $0x4] sm:$0x1 pattern:$0x73625140] %v2249_v43 }
0x1431   :  { %3620 = vst.sshfl [vmem:[#allocation13 + $0xc] sm:$0x1 pattern:$0x73625140] %v2250_v44 }
0x1432   :  { %v2414_v45 = vpop.f32.mrb[28].mxu1 }
0x1433   :  { %v2415_v46 = vadd.f32 %v4964_v34, %v2414_v45  ;;  %v4102_v47 = vpop.f32.mrb[29].mxu1 }
0x1435   :  { %v2418_v48 = vmax.f32 %v2415_v46, 0.0  ;;  %v4516_v46 = vld [vmem:[#allocation4 + $0x8] sm:$0xff] }
0x1436   :  { %v3106_v47 = vrot.slane %v4516_v46, 6 }
0x1437   :  { %4119 = vmatmul.mubr.msk.f32.vlgmr.msra.gmra.mrb[30].mxu1 %vm383_vm4, %v2418_v48 }
0x1438   :  { %4398 = vmatpush3.bf16.msra.mxu1 %v4882_v5  ;;  %4140 = vmatprep.mubr.msk.f32.mxu1 %vm4714_vm0, %v4715_v1 }
0x1439   :  { %4399 = vmatprep.subr.bf16.mxu1 %v4713_v0 }
0x143c   :  { %4401 = vmatpush3.bf16.msra.mxu1 %v4896_v10 }
0x143d   :  { %4408 = vmatprep.subr.bf16.mxu1 %v4713_v0 }
0x143f   :  { %4141 = vmatmul.mubr.msk.f32.vlgmr.msra.gmra.mrb[32].mxu1 %vm156_vm2, %v2689_v63 }
0x1440   :  { %4410 = vmatpush3.bf16.msra.mxu1 %v4929_v20  ;;  %4162 = vmatprep.mubr.msk.f32.mxu1 %vm4714_vm0, %v4715_v1 }
0x1441   :  { %4411 = vmatprep.subr.bf16.mxu1 %v4713_v0 }
0x1444   :  { %4413 = vmatpush3.bf16.msra.mxu1 %v4949_v29 }
0x1445   :  { %4417 = vmatprep.subr.bf16.mxu1 %v4713_v0 }
0x150a   :  { %v2558_v49 = vpop.f32.mrb[30].mxu1 }
0x150b   :  { %v2559_v50 = vadd.f32 %v2558_v49, %v2485_v38  ;;  %v4120_v51 = vpop.f32.mrb[31].mxu1 }
0x150d   :  { %v2562_v52 = vadd.f32 %v4977_v42, %v2559_v50 }
0x150f   :  { %4497 = vtanh.f32 %v2562_v52  ;;  %v2563_v54 = vmul.f32 0.5, %v2562_v52 }
0x1511   :  { %4499 = vtanh.f32 %v2563_v54 }
0x1512   :  { %v2758_v8 = vpop.f32.mrb[32].mxu1 }
0x1513   :  { %v4142_v60 = vpop.f32.mrb[33].mxu1  ;;  %v2759_v15 = vadd.f32 %v4933_v21, %v2758_v8 }
0x1515   :  { %v2762_v16 = vmax.f32 %v2759_v15, 0.0 }
0x1519   :  { %v4498_v53 = vpop.eup %4497 }
0x151a   :  { %2570 = vrot.lane.b32.xlu1 %v4498_v53, %s4716_s18 }
0x151b   :  { %v4500_v55 = vpop.eup %4499 }
0x151c   :  { %v2565_v56 = vmul.f32 0.5, %v4500_v55 }
0x151e   :  { %v2566_v57 = vadd.f32 0.5, %v2565_v56 }
0x1520   :  { %v2568_v3 = vmul.f32 %v2566_v57, %v5204_v23 }
0x158c   :  { %v2571_v58 = vpop.permute.xlu1 %2570 }
0x158d   :  { %v2573_v59 = vmul.f32 %v2571_v58, %v2566_v57 }
0x158f   :  { %2575 = vrot.lane.b32.xlu0 %v2573_v59, %s4717_s19 }
0x1601   :  { %v2576_v13 = vpop.permute.xlu0 %2575 }
0x1602   :  { %v5253_v6 = vadd.f32 %v2576_v13, %v2568_v3 }
0x1604   :  { %4501 = vtanh.f32 %v5253_v6 }
0x160e   :  { %v4502_v7 = vpop.eup %4501 }
0x160f   :  { %2581 = vrot.lane.b32.xlu1 %v4502_v7, %s4716_s18  ;;  %v4519_v7 = vld [vmem:[%s5382_s7] ss:$0 sm:$0xff]  ;;  %s4719_s7 = smov 96  }
0x1681   :  { %v2582_v9 = vpop.permute.xlu1 %2581 }
0x1682   :  { %v2584_v11 = vmul.f32 %v2582_v9, %v2566_v57 }
0x1684   :  { %2586 = vrot.lane.b32.xlu0 %v2584_v11, %s4717_s19 }
0x16f6   :  { %v2587_v14 = vpop.permute.xlu0 %2586 }
0x16f7   :  { %4130 = vmatmul.mubr.msk.f32.vlgmr.msra.gmra.mrb[26].mxu0 %vm156_vm2, %v2587_v14  ;;  %4163 = vmatmul.mubr.msk.f32.vlgmr.msra.gmra.mrb[34].mxu1 %vm156_vm2, %v2587_v14 }
0x16f8   :  { %4404 = vmatpush3.bf16.msra.mxu0 %v4899_v12  ;;  %4151 = vmatprep.mubr.msk.f32.mxu0 %vm4714_vm0, %v4715_v1 }
0x16f9   :  { %4405 = vmatprep.subr.bf16.mxu0 %v4713_v0  ;;  %4419 = vmatpush3.bf16.msra.mxu1 %v4996_v2 }
0x16fa   :  { %4420 = vmatprep.subr.bf16.mxu1 %v4713_v0  ;;  %4180 = vmatprep.mubr.msk.f32.mxu1 %vm4714_vm0, %v4715_v1 }
0x16fc   :  { %4407 = vmatpush3.bf16.msra.mxu0 %v4919_v17 }
0x16fd   :  { %4414 = vmatprep.subr.bf16.mxu0 %v4713_v0  ;;  %4422 = vmatpush3.bf16.msra.mxu1 %v4999_v4 }
0x16fe   :  { %4429 = vmatprep.subr.bf16.mxu1 %v4713_v0 }
0x16ff   :  { %4152 = vmatmul.mubr.msk.f32.vlgmr.msra.gmra.mrb[28].mxu0 %vm156_vm2, %v2762_v16 }
0x1700   :  { %4416 = vmatpush3.bf16.msra.mxu0 %v4951_v32  ;;  %4169 = vmatprep.mubr.msk.f32.mxu0 %vm4714_vm0, %v4715_v1 }
0x1701   :  { %4423 = vmatprep.subr.bf16.mxu0 %v4713_v0 }
0x17ca   :  { %v2656_v21 = vpop.f32.mrb[26].mxu0  ;;  %v2903_v18 = vpop.f32.mrb[34].mxu1 }
0x17cb   :  { %v2657_v19 = vadd.f32 %v5029_v26, %v2656_v21  ;;  %v4131_v22 = vpop.f32.mrb[27].mxu0  ;;  %v4164_v23 = vpop.f32.mrb[35].mxu1 }
0x17cd   :  { %v2667_v24 = vrot.slane %v2657_v19, %v5031_v27 }
0x17cf   :  { %v2668_v25 = vcombine.high %v2667_v24, %v2667_v24  ;;  %3626 = vst.sshfl [vmem:[#allocation13 + $0x5] sm:$0x1 pattern:$0x73625140] %v2667_v24 }
0x17d1   :  { %3627 = vst.sshfl [vmem:[#allocation13 + $0xd] sm:$0x1 pattern:$0x73625140] %v2668_v25 }
0x17d2   :  { %v2832_v28 = vpop.f32.mrb[28].mxu0 }
0x17d3   :  { %v2833_v30 = vadd.f32 %v4964_v34, %v2832_v28  ;;  %v4153_v31 = vpop.f32.mrb[29].mxu0 }
0x17d5   :  { %v2836_v33 = vmax.f32 %v2833_v30, 0.0 }
0x17d7   :  { %4170 = vmatmul.mubr.msk.f32.vlgmr.msra.gmra.mrb[30].mxu0 %vm383_vm4, %v2836_v33 }
0x17d8   :  { %4425 = vmatpush3.bf16.msra.mxu0 %v4882_v5  ;;  %4191 = vmatprep.mubr.msk.f32.mxu0 %vm4714_vm0, %v4715_v1 }
0x17d9   :  { %4426 = vmatprep.subr.bf16.mxu0 %v4713_v0 }
0x17dc   :  { %4428 = vmatpush3.bf16.msra.mxu0 %v4896_v10  ;;  %v4515_v10 = vld [vmem:[#allocation4] sm:$0xff] }
0x17dd   :  { %4435 = vmatprep.subr.bf16.mxu0 %v4713_v0  ;;  %v3105_v45 = vrot.slane %v4515_v10, 7 }
0x17df   :  { %v3107_v48 = vsel %vm154_vm1, %v3106_v47, %v3105_v45 }
0x17e0   :  { %4192 = vmatmul.mubr.msk.f32.vlgmr.msra.gmra.mrb[32].mxu0 %vm156_vm2, %v3107_v48 }
0x17e1   :  { %4437 = vmatpush3.bf16.msra.mxu0 %v4929_v20  ;;  %4213 = vmatprep.mubr.msk.f32.mxu0 %vm4714_vm0, %v4715_v1 }
0x17e2   :  { %4438 = vmatprep.subr.bf16.mxu0 %v4713_v0 }
0x17e5   :  { %4440 = vmatpush3.bf16.msra.mxu0 %v4949_v29  ;;  %v4517_v29 = vld [vmem:[#allocation7] ss:$0 sm:$0xff] }
0x17e6   :  { %4444 = vmatprep.subr.bf16.mxu0 %v4713_v0 }
0x18aa   :  { %v2976_v35 = vpop.f32.mrb[30].mxu0 }
0x18ab   :  { %v2977_v36 = vadd.f32 %v2976_v35, %v2903_v18  ;;  %v4171_v37 = vpop.f32.mrb[31].mxu0 }
0x18ad   :  { %v2980_v34 = vadd.f32 %v4977_v42, %v2977_v36 }
0x18af   :  { %4503 = vtanh.f32 %v2980_v34  ;;  %v2981_v39 = vmul.f32 0.5, %v2980_v34 }
0x18b1   :  { %4505 = vtanh.f32 %v2981_v39 }
0x18b3   :  { %v3176_v52 = vpop.f32.mrb[32].mxu0 }
0x18b4   :  { %v4193_v53 = vpop.f32.mrb[33].mxu0  ;;  %v3177_v56 = vadd.f32 %v4517_v29, %v3176_v52 }
0x18b6   :  { %v3180_v57 = vmax.f32 %v3177_v56, 0.0 }
0x18b9   :  { %v4504_v38 = vpop.eup %4503 }
0x18ba   :  { %2988 = vrot.lane.b32.xlu1 %v4504_v38, %s4716_s18 }
0x18bb   :  { %v4506_v5 = vpop.eup %4505 }
0x18bc   :  { %v2983_v40 = vmul.f32 0.5, %v4506_v5 }
0x18be   :  { %v2984_v41 = vadd.f32 0.5, %v2983_v40 }
0x18c0   :  { %v2986_v42 = vmul.f32 %v2984_v41, %v5253_v6 }
0x192c   :  { %v2989_v43 = vpop.permute.xlu1 %2988 }
0x192d   :  { %v2991_v44 = vmul.f32 %v2989_v43, %v2984_v41 }
0x192f   :  { %2993 = vrot.lane.b32.xlu0 %v2991_v44, %s4717_s19 }
0x19a1   :  { %v2994_v49 = vpop.permute.xlu0 %2993 }
0x19a2   :  { %v2996_v50 = vadd.f32 %v2994_v49, %v2986_v42 }
0x19a4   :  { %4507 = vtanh.f32 %v2996_v50 }
0x19ae   :  { %v4508_v51 = vpop.eup %4507 }
0x19af   :  { %2999 = vrot.lane.b32.xlu1 %v4508_v51, %s4716_s18 }
0x1a21   :  { %v3000_v20 = vpop.permute.xlu1 %2999 }
0x1a22   :  { %v3002_v54 = vmul.f32 %v3000_v20, %v2984_v41 }
0x1a24   :  { %3004 = vrot.lane.b32.xlu0 %v3002_v54, %s4717_s19 }
0x1a96   :  { %v3005_v55 = vpop.permute.xlu0 %3004 }
0x1a97   :  { %4181 = vmatmul.mubr.msk.f32.vlgmr.msra.gmra.mrb[36].mxu1 %vm156_vm2, %v3005_v55  ;;  %4214 = vmatmul.mubr.msk.f32.vlgmr.msra.gmra.mrb[34].mxu0 %vm156_vm2, %v3005_v55 }
0x1a98   :  { %4431 = vmatpush3.bf16.msra.mxu1 %v4899_v12  ;;  %4202 = vmatprep.mubr.msk.f32.mxu1 %vm4714_vm0, %v4715_v1 }
0x1a99   :  { %4432 = vmatprep.subr.bf16.mxu1 %v4713_v0  ;;  %4446 = vmatpush3.bf16.msra.mxu0 %v4996_v2 }
0x1a9a   :  { %4447 = vmatprep.subr.bf16.mxu0 %v4713_v0  ;;  %4231 = vmatprep.mubr.msk.f32.mxu0 %vm4714_vm0, %v4715_v1 }
0x1a9c   :  { %4434 = vmatpush3.bf16.msra.mxu1 %v4919_v17 }
0x1a9d   :  { %4441 = vmatprep.subr.bf16.mxu1 %v4713_v0  ;;  %4449 = vmatpush3.bf16.msra.mxu0 %v4999_v4  ;;  %v4518_v4 = vld [vmem:[#allocation9] ss:$0 sm:$0xff] }
0x1a9f   :  { %4203 = vmatmul.mubr.msk.f32.vlgmr.msra.gmra.mrb[38].mxu1 %vm156_vm2, %v3180_v57 }
0x1aa0   :  { %4443 = vmatpush3.bf16.msra.mxu1 %v4951_v32  ;;  %4220 = vmatprep.mubr.msk.f32.mxu1 %vm4714_vm0, %v4715_v1 }
0x1b6a   :  { %v3074_v12 = vpop.f32.mrb[36].mxu1  ;;  %v3321_v2 = vpop.f32.mrb[34].mxu0 }
0x1b6b   :  { %v3075_v58 = vadd.f32 %v5029_v26, %v3074_v12  ;;  %v4182_v59 = vpop.f32.mrb[37].mxu1  ;;  %v4215_v61 = vpop.f32.mrb[35].mxu0 }
0x1b6d   :  { %v3085_v62 = vrot.slane %v3075_v58, %v5031_v27 }
0x1b6f   :  { %v3086_v17 = vcombine.high %v3085_v62, %v3085_v62  ;;  %3633 = vst.sshfl [vmem:[#allocation13 + $0x6] sm:$0x1 pattern:$0x73625140] %v3085_v62 }
0x1b71   :  { %3634 = vst.sshfl [vmem:[#allocation13 + $0xe] sm:$0x1 pattern:$0x73625140] %v3086_v17 }
0x1b72   :  { %v3250_v0 = vpop.f32.mrb[38].mxu1 }
0x1b73   :  { %v3251_v63 = vadd.f32 %v4518_v4, %v3250_v0  ;;  %v4204_v3 = vpop.f32.mrb[39].mxu1 }
0x1b75   :  { %v3254_v13 = vmax.f32 %v3251_v63, 0.0 }
0x1b77   :  { %4221 = vmatmul.mubr.msk.f32.vlgmr.msra.gmra.mrb[40].mxu1 %vm383_vm4, %v3254_v13 }
0x1c4a   :  { %v3394_v32 = vpop.f32.mrb[40].mxu1 }
0x1c4b   :  { %v3395_v1 = vadd.f32 %v3394_v32, %v3321_v2  ;;  %v4222_v6 = vpop.f32.mrb[41].mxu1 }
0x1c4d   :  { %v3398_v8 = vadd.f32 %v4519_v7, %v3395_v1 }
0x1c4f   :  { %4509 = vtanh.f32 %v3398_v8  ;;  %v3399_v9 = vmul.f32 0.5, %v3398_v8 }
0x1c51   :  { %4511 = vtanh.f32 %v3399_v9 }
0x1c59   :  { %v4510_v60 = vpop.eup %4509 }
0x1c5a   :  { %3406 = vrot.lane.b32.xlu1 %v4510_v60, %s4716_s18 }
0x1c5b   :  { %v4512_v11 = vpop.eup %4511 }
0x1c5c   :  { %v3401_v14 = vmul.f32 0.5, %v4512_v11 }
0x1c5e   :  { %v3402_v15 = vadd.f32 0.5, %v3401_v14 }
0x1c60   :  { %v3404_v18 = vmul.f32 %v3402_v15, %v2996_v50 }
0x1ccc   :  { %v3407_v16 = vpop.permute.xlu1 %3406 }
0x1ccd   :  { %v3409_v21 = vmul.f32 %v3407_v16, %v3402_v15 }
0x1ccf   :  { %3411 = vrot.lane.b32.xlu0 %v3409_v21, %s4717_s19 }
0x1d41   :  { %v3412_v19 = vpop.permute.xlu0 %3411 }
0x1d42   :  { %v3414_v22 = vadd.f32 %v3412_v19, %v3404_v18 }
0x1d44   :  { %4513 = vtanh.f32 %v3414_v22 }
0x1d4e   :  { %v4514_v23 = vpop.eup %4513 }
0x1d4f   :  { %3417 = vrot.lane.b32.xlu1 %v4514_v23, %s4716_s18 }
0x1d53   :  { %3527 = vrot.lane.b32.xlu1 %v3414_v22, %s4719_s7 }
0x1dc1   :  { %v3418_v24 = vpop.permute.xlu1 %3417 }
0x1dc2   :  { %v3420_v25 = vmul.f32 %v3418_v24, %v3402_v15 }
0x1dc4   :  { %3422 = vrot.lane.b32.xlu0 %v3420_v25, %s4717_s19 }
0x1dc5   :  { %v3528_v28 = vpop.permute.xlu1 %3527 }
0x1dc6   :  { %3530 = vst.msk [vmem:[#allocation3] sm:$0x3] %vm115_vm3, %v3528_v28  ;;  %3535 = vst.msk [vmem:[#allocation16] sm:$0x3] %vm115_vm3, %v3528_v28 }
0x1e36   :  { %v3423_v30 = vpop.permute.xlu0 %3422 }
0x1e37   :  { %3525 = vst.msk [vmem:[#allocation2] sm:$0x3] %vm115_vm3, %v3423_v30  ;;  %3534 = vst.msk [vmem:[#allocation14] sm:$0x3] %vm115_vm3, %v3423_v30  ;;  %4232 = vmatmul.mubr.msk.f32.vlgmr.msra.gmra.mrb[36].mxu0 %vm156_vm2, %v3423_v30 }
0x1e38   :  { %4641 = shalt.err (!%p4638_p2)
}
0x1e39   :  { %s4642_s26 = scalar_lea.hbm %s5388_s13, 32 }
0x1e3a   :  { %p4643_p3 = scmp.ne.s32.totalorder %s5388_s13, %s4642_s26  ;;  %p4646_p4 = scmp.lt.u32.totalorder %s4642_s26, %s5388_s13 }
0x1e3c   :  { %p4648_p5 = pnand %p4646_p4, %p4643_p3 }
0x1e3e   :  { %4651 = shalt.err (!%p4648_p5)
}
0x1e3f   :  { %3557 = dma.vmem_to_hbm [thread:$0]  %s3555_s1, 32, %s5388_s13, [#allocation15]  }
0x1e40   :  { %s4721_s15 = smov [#allocation16]  }
0x1e41   :  { %s3564_s16 = sshll.u32 %s4721_s15, 4  ;;  %s3565_s16 = int_to_ptr.vmem [resolvable:$true] %s3564_s16 }
0x1e42   :  { %s4652_s17 = scalar_lea.vmem %s3565_s16, 32  ;;  %p4657_p7 = scmp.lt.s32.totalorder %s3565_s16, %s3565_s16 }
0x1e43   :  { %p4653_p6 = scmp.ne.s32.totalorder %s3565_s16, %s4652_s17  ;;  %p4658_p8 = scmp.lt.s32.totalorder %s4652_s17, %s4652_s17 }
0x1e45   :  { %p4659_p9 = por %p4658_p8, %p4657_p7 }
0x1e47   :  { %p4660_p10 = pnand %p4659_p9, %p4653_p6 }
0x1e49   :  { %4663 = shalt.err (!%p4660_p10)
}
0x1e4a   :  { %s4664_s0 = scalar_lea.hbm %s5389_s14, 32 }
0x1e4b   :  { %p4665_p11 = scmp.ne.s32.totalorder %s5389_s14, %s4664_s0  ;;  %p4668_p12 = scmp.lt.u32.totalorder %s4664_s0, %s5389_s14 }
0x1e4d   :  { %p4670_p13 = pnand %p4668_p12, %p4665_p11 }
0x1e4f   :  { %4673 = shalt.err (!%p4670_p13)
}
0x1e50   :  { %3567 = dma.vmem_to_hbm [thread:$0]  %s3565_s16, 32, %s5389_s14, [#allocation15]  }
0x1e51   :  { %s4722_s9 = smov [#allocation13]  }
0x1e52   :  { %s3541_s27 = sshll.u32 %s4722_s9, 4  ;;  %s3542_s27 = int_to_ptr.vmem [resolvable:$true] %s3541_s27 }
0x1e53   :  { %s4674_s7 = scalar_lea.vmem %s3542_s27, 256  ;;  %p4679_p1 = scmp.lt.s32.totalorder %s3542_s27, %s3542_s27 }
0x1e54   :  { %p4675_p0 = scmp.ne.s32.totalorder %s3542_s27, %s4674_s7  ;;  %p4680_p2 = scmp.lt.s32.totalorder %s4674_s7, %s4674_s7 }
0x1e56   :  { %p4681_p3 = por %p4680_p2, %p4679_p1 }
0x1e58   :  { %p4682_p4 = pnand %p4681_p3, %p4675_p0 }
0x1f0a   :  { %v3492_v31 = vpop.f32.mrb[36].mxu0 }
0x1f0b   :  { %v3493_v33 = vadd.f32 %v5029_v26, %v3492_v31  ;;  %v4233_v35 = vpop.f32.mrb[37].mxu0 }
0x1f0d   :  { %v3503_v36 = vrot.slane %v3493_v33, %v5031_v27 }
0x1f0f   :  { %v3504_v37 = vcombine.high %v3503_v36, %v3503_v36  ;;  %3640 = vst.sshfl [vmem:[#allocation13 + $0x7] sm:$0x1 pattern:$0x73625140] %v3503_v36 }
0x1f11   :  { %3641 = vst.sshfl [vmem:[#allocation13 + $0xf] sm:$0x1 pattern:$0x73625140] %v3504_v37 }
0x1f12   :  { %4685 = shalt.err (!%p4682_p4)
}
0x1f13   :  { %s4686_s1 = scalar_lea.hbm %s5387_s12, 256 }
0x1f14   :  { %p4687_p5 = scmp.ne.s32.totalorder %s5387_s12, %s4686_s1  ;;  %p4690_p6 = scmp.lt.u32.totalorder %s4686_s1, %s5387_s12 }
0x1f16   :  { %p4692_p7 = pnand %p4690_p6, %p4687_p5 }
0x1f18   :  { %4695 = shalt.err (!%p4692_p7)
}
0x1f19   :  { %3547 = dma.vmem_to_hbm [thread:$0]  %s3542_s27, 256, %s5387_s12, [#allocation6], %s4709_s30, %s4709_s30, %s4710_s22  }
0x1f1a   :  { %4702 = dma.done.wait [#allocation6], 256  }
0x1f1b   :  { %4703 = vsyncadd [#allocation6], 4294967040 }
0x1f1c   :  { %4704 = dma.done.wait [#allocation15], 64  }
0x1f1d   :  { %4705 = vsyncadd [#allocation15], 4294967232 }
0x1f1e   :  { %3577 = vsyncpa [#allocation5], 1 }
0x1f1f   :  { %3578 = vsyncpa [#allocation8], 1 }
0x1f20   :  { %3579 = vsyncpa [#allocation11], 1 }
0x1f21   :  { %3580 = vsyncpa [#allocation6], 1 }
0x1f22   :  { %3581 = vsyncpa [#allocation15], 1 }

</bundles_post_ra>
